<compile_context>
chip_gen: v7x
topology: tpu7x:2x2x1
jax: 0.10.0
libtpu: 0.0.40
codegen_flags: <defaults>
</compile_context>

<pallas_src>
import functools

import jax
import jax.numpy as jnp
from jax.experimental import pallas as pl
from jax.experimental.pallas import tpu as pltpu

F32 = jnp.float32


def _vmem_limit_bytes():
    # Leave ~25% headroom for double-buffering; never exceed physical VMEM
    # (v7x has only 64 MiB per TensorCore, v5e/v6e have 128 MiB).
    try:
        cap = pltpu.get_tpu_info().vmem_capacity_bytes
    except Exception:
        cap = 64 * 1024 * 1024
    return int(cap * 3 // 4)


_VMEM_LIMIT = _vmem_limit_bytes()


def _pick_row_block(H, W, target_rows=2048):
    """Largest divisor of H keeping the flattened matmul M-dim (rows*W) <= target."""
    best = 1
    for r in range(1, H + 1):
        if H % r == 0 and r * W <= target_rows:
            best = r
    return best


def conv3x3_fused(x, w, b=None, *, relu_in=False, residual=None,
                  block_rows=None, dot_dtype=jnp.bfloat16):
    """SAME-padded 3x3 conv, NHWC input, HWIO weights.

    Fuses: optional input ReLU, bias add, optional residual add.
    The 9 taps are im2col'ed inside the kernel into a single MXU matmul.
    """
    N, H, W, Cin = x.shape
    K, K2, Cin_w, Cout = w.shape
    assert K == 3 and K2 == 3 and Cin_w == Cin
    pad = K // 2

    xp = jnp.pad(x.astype(F32), ((0, 0), (pad, pad), (pad, pad), (0, 0)))
    Hp, Wp = H + 2 * pad, W + 2 * pad

    # Weights pre-reshaped to the im2col layout (K*K*Cin, Cout) and cast to the
    # matmul dtype (bf16 halves weight HBM/VMEM traffic; accumulation stays f32).
    w2 = w.reshape(K * K * Cin, Cout).astype(dot_dtype)
    b2 = (jnp.zeros((Cout,), F32) if b is None else b).reshape(1, Cout).astype(F32)

    # Channel blocking: keep lane dim dense (>=128) whenever channels allow it.
    # NOTE: for Cout < 128 (not the case here) stores are lane-masked; prefer
    # features that are a multiple of 128.
    bco = Cout if Cout <= 256 else 128
    assert Cout % bco == 0
    n_co = Cout // bco

    TH = block_rows if block_rows is not None else _pick_row_block(H, W)
    assert H % TH == 0
    n_r = H // TH

    has_res = residual is not None

    def kernel(x_ref, w_ref, b_ref, *rest):
        if has_res:
            res_ref, o_ref = rest
        else:
            (o_ref,) = rest
        r = pl.program_id(1)
        row0 = pl.multiple_of(r * TH, TH)

        # One slab load (+ halo rows), ReLU applied once in f32, then 9 static
        # shifted views concatenated along channels -> im2col operand.
        slab = x_ref[:, pl.ds(row0, TH + 2 * pad), :, :]      # (1, TH+2, Wp, Cin)
        if relu_in:
            slab = jnp.maximum(slab, 0.0)
        taps = [slab[:, dy:dy + TH, dx:dx + W, :]             # (1, TH, W, Cin)
                for dy in range(K) for dx in range(K)]
        patch = jnp.concatenate(taps, axis=-1)                # (1, TH, W, 9*Cin)
        lhs = patch.reshape(TH * W, K * K * Cin).astype(dot_dtype)

        # Single MXU matmul, contraction K = 9*Cin, f32 accumulation.
        acc = jnp.dot(lhs, w_ref[...], preferred_element_type=F32)   # (TH*W, bco)
        acc = acc + b_ref[...]

        out = acc.reshape(1, TH, W, bco)
        if has_res:
            out = out + res_ref[...]
        o_ref[...] = out.astype(o_ref.dtype)

    in_specs = [
        # Padded input: resident per image (index constant over row/Cout axes).
        pl.BlockSpec((1, Hp, Wp, Cin), lambda n, r, c: (n, 0, 0, 0)),
        pl.BlockSpec((K * K * Cin, bco), lambda n, r, c: (0, c)),
        pl.BlockSpec((1, bco), lambda n, r, c: (0, c)),
    ]
    args = [xp, w2, b2]
    if has_res:
        in_specs.append(pl.BlockSpec((1, TH, W, bco), lambda n, r, c: (n, r, 0, c)))
        args.append(residual.astype(F32))

    return pl.pallas_call(
        kernel,
        out_shape=jax.ShapeDtypeStruct((N, H, W, Cout), F32),
        grid=(N, n_r, n_co),
        in_specs=in_specs,
        out_specs=pl.BlockSpec((1, TH, W, bco), lambda n, r, c: (n, r, 0, c)),
        compiler_params=pltpu.CompilerParams(
            dimension_semantics=("parallel", "parallel", "parallel"),
            vmem_limit_bytes=_VMEM_LIMIT,
        ),
    )(*args)


def residual_conv_unit(params, x, *, block_rows=None, dot_dtype=jnp.bfloat16):
    """ResidualConvUnit.forward: conv2(relu(conv1(relu(x)))) + x  (NHWC)."""
    h = conv3x3_fused(x, params["w1"], params["b1"], relu_in=True,
                      block_rows=block_rows, dot_dtype=dot_dtype)
    return conv3x3_fused(h, params["w2"], None, relu_in=True, residual=x,
                         block_rows=block_rows, dot_dtype=dot_dtype)


# ----------------------------------------------------------------------------
# Deterministic parameters + pure-JAX reference (test-only glue)
# ----------------------------------------------------------------------------
def build_params(features):
    k = jax.random.PRNGKey(0)
    k1, k2, k3 = jax.random.split(k, 3)
    std = (2.0 / (9 * features)) ** 0.5
    return dict(
        w1=jax.random.normal(k1, (3, 3, features, features), F32) * std,
        b1=jax.random.normal(k2, (features,), F32) * 0.1,
        w2=jax.random.normal(k3, (3, 3, features, features), F32) * std,
    )


def _reference_rcu(params, x):
    dn = ("NHWC", "HWIO", "NHWC")

    def conv(h, w, b):
        y = jax.lax.conv_general_dilated(
            h, w, (1, 1), "SAME", dimension_numbers=dn,
            precision=jax.lax.Precision.HIGHEST)
        return y if b is None else y + b

    h = conv(jnp.maximum(x, 0.0), params["w1"], params["b1"])
    h = conv(jnp.maximum(h, 0.0), params["w2"], None)
    return h + x


if __name__ == "__main__":
    batch, size, features = 2, 16, 128   # features multiple of 128 -> lane-dense stores
    params = build_params(features)
    x = jax.random.normal(jax.random.PRNGKey(0), (batch, size, size, features), F32)

    rcu = jax.jit(functools.partial(residual_conv_unit, block_rows=8))
    out = jax.block_until_ready(rcu(params, x))

    ref = _reference_rcu(params, x)
    assert out.shape == ref.shape == (batch, size, size, features), out.shape
    assert bool(jnp.all(jnp.isfinite(out)))

    # bf16 MXU operands with f32 accumulation -> small, bounded numerical noise.
    rel_l2 = float(jnp.linalg.norm(out - ref) / jnp.linalg.norm(ref))
    max_abs = float(jnp.max(jnp.abs(out - ref)))
    assert rel_l2 < 2e-2, rel_l2
    assert max_abs < 3e-1, max_abs

    print("KERNEL_OK")
</pallas_src>

<mosaic_0001>
module attributes {stable_mosaic.version = 11 : i64} {
  func.func @kernel(%arg0: i32, %arg1: i32, %arg2: i32, %arg3: memref<1x18x18x128xf32, #tpu.memory_space<vmem>>, %arg4: memref<1152x128xbf16, #tpu.memory_space<vmem>>, %arg5: memref<1x128xf32, #tpu.memory_space<vmem>>, %arg6: memref<1x8x16x128xf32, #tpu.memory_space<vmem>>) attributes {dimension_semantics = [#tpu.dimension_semantics<parallel>, #tpu.dimension_semantics<parallel>, #tpu.dimension_semantics<parallel>], iteration_bounds = array<i64: 2, 2, 1>, scalar_prefetch = 0 : i64, scratch_operands = 0 : i64, tpu.core_type = #tpu.core_type<tc>, window_params = [{transform_indices = @transform_0, window_bounds = array<i64: 1, 18, 18, 128>}, {transform_indices = @transform_1, window_bounds = array<i64: 1152, 128>}, {transform_indices = @transform_2, window_bounds = array<i64: 1, 128>}, {transform_indices = @transform_3, window_bounds = array<i64: 1, 8, 16, 128>}]} {
    %c8_i32 = arith.constant 8 : i32
    %0 = arith.muli %arg1, %c8_i32 : i32
    %1 = tpu.assume_multiple %0, 8 : i32
    %c0 = arith.constant 0 : index
    %2 = arith.index_cast %1 : i32 to index
    %c0_0 = arith.constant 0 : index
    %c0_1 = arith.constant 0 : index
    %3 = vector.load %arg3[%c0, %2, %c0_0, %c0_1] : memref<1x18x18x128xf32, #tpu.memory_space<vmem>>, vector<1x10x18x128xf32>
    %cst = arith.constant 0.000000e+00 : f32
    %4 = vector.broadcast %cst : f32 to vector<1x10x18x128xf32>
    %5 = arith.maximumf %3, %4 : vector<1x10x18x128xf32>
    %6 = vector.extract_strided_slice %5 {offsets = [0, 0, 0, 0], sizes = [1, 8, 16, 128], strides = [1, 1, 1, 1]} : vector<1x10x18x128xf32> to vector<1x8x16x128xf32>
    %7 = vector.extract_strided_slice %5 {offsets = [0, 0, 1, 0], sizes = [1, 8, 16, 128], strides = [1, 1, 1, 1]} : vector<1x10x18x128xf32> to vector<1x8x16x128xf32>
    %8 = vector.extract_strided_slice %5 {offsets = [0, 0, 2, 0], sizes = [1, 8, 16, 128], strides = [1, 1, 1, 1]} : vector<1x10x18x128xf32> to vector<1x8x16x128xf32>
    %9 = vector.extract_strided_slice %5 {offsets = [0, 1, 0, 0], sizes = [1, 8, 16, 128], strides = [1, 1, 1, 1]} : vector<1x10x18x128xf32> to vector<1x8x16x128xf32>
    %10 = vector.extract_strided_slice %5 {offsets = [0, 1, 1, 0], sizes = [1, 8, 16, 128], strides = [1, 1, 1, 1]} : vector<1x10x18x128xf32> to vector<1x8x16x128xf32>
    %11 = vector.extract_strided_slice %5 {offsets = [0, 1, 2, 0], sizes = [1, 8, 16, 128], strides = [1, 1, 1, 1]} : vector<1x10x18x128xf32> to vector<1x8x16x128xf32>
    %12 = vector.extract_strided_slice %5 {offsets = [0, 2, 0, 0], sizes = [1, 8, 16, 128], strides = [1, 1, 1, 1]} : vector<1x10x18x128xf32> to vector<1x8x16x128xf32>
    %13 = vector.extract_strided_slice %5 {offsets = [0, 2, 1, 0], sizes = [1, 8, 16, 128], strides = [1, 1, 1, 1]} : vector<1x10x18x128xf32> to vector<1x8x16x128xf32>
    %14 = vector.extract_strided_slice %5 {offsets = [0, 2, 2, 0], sizes = [1, 8, 16, 128], strides = [1, 1, 1, 1]} : vector<1x10x18x128xf32> to vector<1x8x16x128xf32>
    %15 = tpu.concatenate %6, %7, %8, %9, %10, %11, %12, %13, %14 in 3 : vector<1x8x16x128xf32>, vector<1x8x16x128xf32>, vector<1x8x16x128xf32>, vector<1x8x16x128xf32>, vector<1x8x16x128xf32>, vector<1x8x16x128xf32>, vector<1x8x16x128xf32>, vector<1x8x16x128xf32>, vector<1x8x16x128xf32> -> vector<1x8x16x1152xf32>
    %16 = vector.shape_cast %15 : vector<1x8x16x1152xf32> to vector<128x1152xf32>
    %17 = arith.truncf %16 : vector<128x1152xf32> to vector<128x1152xbf16>
    %c0_2 = arith.constant 0 : index
    %c0_3 = arith.constant 0 : index
    %18 = vector.load %arg4[%c0_2, %c0_3] : memref<1152x128xbf16, #tpu.memory_space<vmem>>, vector<1152x128xbf16>
    %cst_4 = arith.constant dense<0.000000e+00> : vector<128x128xf32>
    %19 = tpu.matmul %17, %18, %cst_4 {dimension_numbers = #tpu.dot_dimension_numbers<[1], [0], [0], [1], [0, 0, 1, 1], [], []>} : vector<128x1152xbf16>, vector<1152x128xbf16>, vector<128x128xf32> -> vector<128x128xf32>
    %c0_5 = arith.constant 0 : index
    %c0_6 = arith.constant 0 : index
    %20 = vector.load %arg5[%c0_5, %c0_6] : memref<1x128xf32, #tpu.memory_space<vmem>>, vector<1x128xf32>
    %21 = vector.broadcast %20 : vector<1x128xf32> to vector<128x128xf32>
    %22 = arith.addf %19, %21 : vector<128x128xf32>
    %23 = vector.shape_cast %22 : vector<128x128xf32> to vector<1x8x16x128xf32>
    %c0_7 = arith.constant 0 : index
    %c0_8 = arith.constant 0 : index
    %c0_9 = arith.constant 0 : index
    %c0_10 = arith.constant 0 : index
    %24 = vector.load %arg6[%c0_7, %c0_8, %c0_9, %c0_10] : memref<1x8x16x128xf32, #tpu.memory_space<vmem>>, vector<1x8x16x128xf32>
    tpu.vector_store %arg6[%c0_7, %c0_8, %c0_9, %c0_10], %23 {strides = array<i32>} : memref<1x8x16x128xf32, #tpu.memory_space<vmem>>, vector<1x8x16x128xf32>,
    return
  }
  func.func @transform_0(%arg0: i32, %arg1: i32, %arg2: i32) -> (i32, i32, i32, i32) {
    %c0_i32 = arith.constant 0 : i32
    %c0_i32_0 = arith.constant 0 : i32
    %c0_i32_1 = arith.constant 0 : i32
    %c0_i32_2 = arith.constant 0 : i32
    return %arg0, %c0_i32, %c0_i32_0, %c0_i32_1 : i32, i32, i32, i32
  }
  func.func @transform_1(%arg0: i32, %arg1: i32, %arg2: i32) -> (i32, i32) {
    %c0_i32 = arith.constant 0 : i32
    %c0_i32_0 = arith.constant 0 : i32
    return %c0_i32, %arg2 : i32, i32
  }
  func.func @transform_2(%arg0: i32, %arg1: i32, %arg2: i32) -> (i32, i32) {
    %c0_i32 = arith.constant 0 : i32
    %c0_i32_0 = arith.constant 0 : i32
    return %c0_i32, %arg2 : i32, i32
  }
  func.func @transform_3(%arg0: i32, %arg1: i32, %arg2: i32) -> (i32, i32, i32, i32) {
    %c0_i32 = arith.constant 0 : i32
    %c0_i32_0 = arith.constant 0 : i32
    return %arg0, %arg1, %c0_i32, %arg2 : i32, i32, i32, i32
  }
}

module attributes {stable_mosaic.version = 11 : i64} {
  func.func @kernel(%arg0: i32, %arg1: i32, %arg2: i32, %arg3: memref<1x18x18x128xf32, #tpu.memory_space<vmem>>, %arg4: memref<1152x128xbf16, #tpu.memory_space<vmem>>, %arg5: memref<1x128xf32, #tpu.memory_space<vmem>>, %arg6: memref<1x8x16x128xf32, #tpu.memory_space<vmem>>, %arg7: memref<1x8x16x128xf32, #tpu.memory_space<vmem>>) attributes {dimension_semantics = [#tpu.dimension_semantics<parallel>, #tpu.dimension_semantics<parallel>, #tpu.dimension_semantics<parallel>], iteration_bounds = array<i64: 2, 2, 1>, scalar_prefetch = 0 : i64, scratch_operands = 0 : i64, tpu.core_type = #tpu.core_type<tc>, window_params = [{transform_indices = @transform_0, window_bounds = array<i64: 1, 18, 18, 128>}, {transform_indices = @transform_1, window_bounds = array<i64: 1152, 128>}, {transform_indices = @transform_2, window_bounds = array<i64: 1, 128>}, {transform_indices = @transform_3, window_bounds = array<i64: 1, 8, 16, 128>}, {transform_indices = @transform_4, window_bounds = array<i64: 1, 8, 16, 128>}]} {
    %c8_i32 = arith.constant 8 : i32
    %0 = arith.muli %arg1, %c8_i32 : i32
    %1 = tpu.assume_multiple %0, 8 : i32
    %c0 = arith.constant 0 : index
    %2 = arith.index_cast %1 : i32 to index
    %c0_0 = arith.constant 0 : index
    %c0_1 = arith.constant 0 : index
    %3 = vector.load %arg3[%c0, %2, %c0_0, %c0_1] : memref<1x18x18x128xf32, #tpu.memory_space<vmem>>, vector<1x10x18x128xf32>
    %cst = arith.constant 0.000000e+00 : f32
    %4 = vector.broadcast %cst : f32 to vector<1x10x18x128xf32>
    %5 = arith.maximumf %3, %4 : vector<1x10x18x128xf32>
    %6 = vector.extract_strided_slice %5 {offsets = [0, 0, 0, 0], sizes = [1, 8, 16, 128], strides = [1, 1, 1, 1]} : vector<1x10x18x128xf32> to vector<1x8x16x128xf32>
    %7 = vector.extract_strided_slice %5 {offsets = [0, 0, 1, 0], sizes = [1, 8, 16, 128], strides = [1, 1, 1, 1]} : vector<1x10x18x128xf32> to vector<1x8x16x128xf32>
    %8 = vector.extract_strided_slice %5 {offsets = [0, 0, 2, 0], sizes = [1, 8, 16, 128], strides = [1, 1, 1, 1]} : vector<1x10x18x128xf32> to vector<1x8x16x128xf32>
    %9 = vector.extract_strided_slice %5 {offsets = [0, 1, 0, 0], sizes = [1, 8, 16, 128], strides = [1, 1, 1, 1]} : vector<1x10x18x128xf32> to vector<1x8x16x128xf32>
    %10 = vector.extract_strided_slice %5 {offsets = [0, 1, 1, 0], sizes = [1, 8, 16, 128], strides = [1, 1, 1, 1]} : vector<1x10x18x128xf32> to vector<1x8x16x128xf32>
    %11 = vector.extract_strided_slice %5 {offsets = [0, 1, 2, 0], sizes = [1, 8, 16, 128], strides = [1, 1, 1, 1]} : vector<1x10x18x128xf32> to vector<1x8x16x128xf32>
    %12 = vector.extract_strided_slice %5 {offsets = [0, 2, 0, 0], sizes = [1, 8, 16, 128], strides = [1, 1, 1, 1]} : vector<1x10x18x128xf32> to vector<1x8x16x128xf32>
    %13 = vector.extract_strided_slice %5 {offsets = [0, 2, 1, 0], sizes = [1, 8, 16, 128], strides = [1, 1, 1, 1]} : vector<1x10x18x128xf32> to vector<1x8x16x128xf32>
    %14 = vector.extract_strided_slice %5 {offsets = [0, 2, 2, 0], sizes = [1, 8, 16, 128], strides = [1, 1, 1, 1]} : vector<1x10x18x128xf32> to vector<1x8x16x128xf32>
    %15 = tpu.concatenate %6, %7, %8, %9, %10, %11, %12, %13, %14 in 3 : vector<1x8x16x128xf32>, vector<1x8x16x128xf32>, vector<1x8x16x128xf32>, vector<1x8x16x128xf32>, vector<1x8x16x128xf32>, vector<1x8x16x128xf32>, vector<1x8x16x128xf32>, vector<1x8x16x128xf32>, vector<1x8x16x128xf32> -> vector<1x8x16x1152xf32>
    %16 = vector.shape_cast %15 : vector<1x8x16x1152xf32> to vector<128x1152xf32>
    %17 = arith.truncf %16 : vector<128x1152xf32> to vector<128x1152xbf16>
    %c0_2 = arith.constant 0 : index
    %c0_3 = arith.constant 0 : index
    %18 = vector.load %arg4[%c0_2, %c0_3] : memref<1152x128xbf16, #tpu.memory_space<vmem>>, vector<1152x128xbf16>
    %cst_4 = arith.constant dense<0.000000e+00> : vector<128x128xf32>
    %19 = tpu.matmul %17, %18, %cst_4 {dimension_numbers = #tpu.dot_dimension_numbers<[1], [0], [0], [1], [0, 0, 1, 1], [], []>} : vector<128x1152xbf16>, vector<1152x128xbf16>, vector<128x128xf32> -> vector<128x128xf32>
    %c0_5 = arith.constant 0 : index
    %c0_6 = arith.constant 0 : index
    %20 = vector.load %arg5[%c0_5, %c0_6] : memref<1x128xf32, #tpu.memory_space<vmem>>, vector<1x128xf32>
    %21 = vector.broadcast %20 : vector<1x128xf32> to vector<128x128xf32>
    %22 = arith.addf %19, %21 : vector<128x128xf32>
    %23 = vector.shape_cast %22 : vector<128x128xf32> to vector<1x8x16x128xf32>
    %c0_7 = arith.constant 0 : index
    %c0_8 = arith.constant 0 : index
    %c0_9 = arith.constant 0 : index
    %c0_10 = arith.constant 0 : index
    %24 = vector.load %arg6[%c0_7, %c0_8, %c0_9, %c0_10] : memref<1x8x16x128xf32, #tpu.memory_space<vmem>>, vector<1x8x16x128xf32>
    %25 = arith.addf %23, %24 : vector<1x8x16x128xf32>
    %c0_11 = arith.constant 0 : index
    %c0_12 = arith.constant 0 : index
    %c0_13 = arith.constant 0 : index
    %c0_14 = arith.constant 0 : index
    %26 = vector.load %arg7[%c0_11, %c0_12, %c0_13, %c0_14] : memref<1x8x16x128xf32, #tpu.memory_space<vmem>>, vector<1x8x16x128xf32>
    tpu.vector_store %arg7[%c0_11, %c0_12, %c0_13, %c0_14], %25 {strides = array<i32>} : memref<1x8x16x128xf32, #tpu.memory_space<vmem>>, vector<1x8x16x128xf32>,
    return
  }
  func.func @transform_0(%arg0: i32, %arg1: i32, %arg2: i32) -> (i32, i32, i32, i32) {
    %c0_i32 = arith.constant 0 : i32
    %c0_i32_0 = arith.constant 0 : i32
    %c0_i32_1 = arith.constant 0 : i32
    %c0_i32_2 = arith.constant 0 : i32
    return %arg0, %c0_i32, %c0_i32_0, %c0_i32_1 : i32, i32, i32, i32
  }
  func.func @transform_1(%arg0: i32, %arg1: i32, %arg2: i32) -> (i32, i32) {
    %c0_i32 = arith.constant 0 : i32
    %c0_i32_0 = arith.constant 0 : i32
    return %c0_i32, %arg2 : i32, i32
  }
  func.func @transform_2(%arg0: i32, %arg1: i32, %arg2: i32) -> (i32, i32) {
    %c0_i32 = arith.constant 0 : i32
    %c0_i32_0 = arith.constant 0 : i32
    return %c0_i32, %arg2 : i32, i32
  }
  func.func @transform_3(%arg0: i32, %arg1: i32, %arg2: i32) -> (i32, i32, i32, i32) {
    %c0_i32 = arith.constant 0 : i32
    %c0_i32_0 = arith.constant 0 : i32
    return %arg0, %arg1, %c0_i32, %arg2 : i32, i32, i32, i32
  }
  func.func @transform_4(%arg0: i32, %arg1: i32, %arg2: i32) -> (i32, i32, i32, i32) {
    %c0_i32 = arith.constant 0 : i32
    %c0_i32_0 = arith.constant 0 : i32
    return %arg0, %arg1, %c0_i32, %arg2 : i32, i32, i32, i32
  }
}

</mosaic_0001>

<bundles_post_ra>
// kernel: residual_conv_unit.2
= control target key start
LH: loop header
LB: loop body
LE: loop exit
PB: predicated region body
PF: predicated region fallthrough
CT: control target
= control target key end

     0   :  { %s2306_s12 = smov 0   ;;  %s2308_s13 = smov 0   ;;  %s2967_s0 = inlined_call_operand.vmem [shape: f32[2,18,18,128], index: 0, kind: input, shape index: {}]   ;;  %s2968_s1 = inlined_call_operand.vmem [shape: bf16[1152,128], index: 1, kind: input, shape index: {}]   ;;  %s2969_s2 = inlined_call_operand.vmem [shape: f32[1,128], index: 2, kind: input, shape index: {}]   ;;  %s2970_s3 = inlined_call_operand.vmem [shape: f32[2,16,16,128], index: 3, kind: output, shape index: {}]  }
   0x1   :  { %s2310_s14 = smov 0   ;;  %s2312_s15 = smov 0  }
   0x2   :  { %s2314_s16 = smov 0  }
   0x3 LB: > { %s28_s17 = sadd.s32 1, %s2276_s14  ;;  %s32_s18 = sadd.s32 1, %s2280_s15  ;;  %s2284_s16 = sphi %s2314_s16, %s13_s16   ;;  %s2280_s15 = sphi %s2312_s15, %s2974_s15   ;;  %s2276_s14 = sphi %s2310_s14, %s2973_s14   ;;  %s2272_s13 = sphi %s2308_s13, %s2972_s13   ;;  %s2268_s12 = sphi %s2306_s12, %s2971_s12  }
   0x4   : > { %p30_p0 = scmp.ge.s32.totalorder %s28_s17, 2  ;;  %p1730_p1 = scmp.ge.s32.totalorder %s2284_s16, 1 }
   0x5   : > { %p177_p2 = scmp.lt.s32.totalorder %s2284_s16, 5 }
   0x6   : > { %s2976_s17 = smov (%p30_p0, %s28_s17), 0  ;;  %s2978_s18 = smov (!%p30_p0, %s32_s18), %s2280_s15 }
   0x7   : > { %p178_p3 = pnand %p1730_p1, %p177_p2  ;;  %p34_p4 = scmp.ge.s32.totalorder %s2978_s18, 2 }
   0x8   : > { %v2174_v0 = vld [vmem:[%s2968_s1 + $0x40] sm:$0xff] (!%p178_p3)   ;;  %v2178_v4 = vld [vmem:[%s2968_s1 + $0x48] sm:$0xff] (!%p178_p3)   ;;  %v2182_v8 = vld [vmem:[%s2968_s1 + $0x50] sm:$0xff] (!%p178_p3)   ;;  %p216_p5 = scmp.lt.s32.totalorder (!%p178_p3), %s2272_s13, 1  ;;  %s1737_s5 = smul.u32 (!%p178_p3), 192, %s2268_s12  ;;  %vm330_vm0 = vcmask (!%p178_p3), 1046528  }
   0x9   : > { %s2980_s18 = smov (%p34_p4, %s2978_s18), 0  ;;  %181 = sbr.rel (%p178_p3) target bundleno = 398 (0x18e), region = 32 }
   0xa   : > { %v2175_v1 = vld [vmem:[%s2968_s1 + $0xc0] sm:$0xff] (!%p178_p3)   ;;  %1813 = vmatprep.subr.bf16.mxu0 (!%p178_p3), %v2174_v0  ;;  %v2179_v5 = vld [vmem:[%s2968_s1 + $0xc8] sm:$0xff] (!%p178_p3)   ;;  %v2183_v9 = vld [vmem:[%s2968_s1 + $0xd0] sm:$0xff] (!%p178_p3)   ;;  %vm387_vm1 = vcmask (!%p178_p3), 1045504   ;;  %s1732_s7 = sshll.u32 (!%p178_p3), %s2268_s12, 3 }
   0xb   : > { %v2176_v2 = vld [vmem:[%s2968_s1] sm:$0xff] (!%p178_p3)   ;;  %1877 = vmatprep.subr.bf16.mxu1 (!%p178_p3), %v2175_v1  ;;  %v2180_v6 = vld [vmem:[%s2968_s1 + $0x8] sm:$0xff] (!%p178_p3)   ;;  %v2184_v10 = vld [vmem:[%s2968_s1 + $0x10] sm:$0xff] (!%p178_p3)   ;;  %p231_p6 = scmp.lt.s32.totalorder (!%p178_p3), %s1732_s7, 15 }
   0xc   : > { %v2177_v3 = vld [vmem:[%s2968_s1 + $0x80] sm:$0xff] (!%p178_p3)   ;;  %1814 = vmatpush3.bf16.msra.mxu0 (!%p178_p3), %v2176_v2  ;;  %v2181_v7 = vld [vmem:[%s2968_s1 + $0x88] sm:$0xff] (!%p178_p3)   ;;  %v2185_v11 = vld [vmem:[%s2968_s1 + $0x90] sm:$0xff] (!%p178_p3)  }
   0xd   : > { %1878 = vmatpush3.bf16.msra.mxu1 (!%p178_p3), %v2177_v3  ;;  %1815 = vmatprep.subr.bf16.mxu0 (!%p178_p3), %v2178_v4  ;;  %v2186_v12 = vld [vmem:[%s2968_s1 + $0x58] sm:$0xff] (!%p178_p3)   ;;  %v2190_v16 = vld [vmem:[%s2968_s1 + $0x60] sm:$0xff] (!%p178_p3)   ;;  %v2194_v20 = vld [vmem:[%s2968_s1 + $0x68] sm:$0xff] (!%p178_p3)  }
   0xe   : > { %1879 = vmatprep.subr.bf16.mxu1 (!%p178_p3), %v2179_v5  ;;  %v2187_v13 = vld [vmem:[%s2968_s1 + $0xd8] sm:$0xff] (!%p178_p3)   ;;  %v2191_v17 = vld [vmem:[%s2968_s1 + $0xe0] sm:$0xff] (!%p178_p3)   ;;  %v2195_v21 = vld [vmem:[%s2968_s1 + $0xe8] sm:$0xff] (!%p178_p3)  }
   0xf   : > { %v2188_v14 = vld [vmem:[%s2968_s1 + $0x18] sm:$0xff] (!%p178_p3)   ;;  %v2192_v18 = vld [vmem:[%s2968_s1 + $0x20] sm:$0xff] (!%p178_p3)   ;;  %v2196_v22 = vld [vmem:[%s2968_s1 + $0x28] sm:$0xff] (!%p178_p3)  }
  0x10   : > { %1816 = vmatpush3.bf16.msra.mxu0 %v2180_v6  ;;  %v2189_v15 = vld [vmem:[%s2968_s1 + $0x98] sm:$0xff]   ;;  %s2982_s13 = smov (!%p216_p5, %s2272_s13), 1  ;;  %v2193_v19 = vld [vmem:[%s2968_s1 + $0xa0] sm:$0xff]   ;;  %v2197_v23 = vld [vmem:[%s2968_s1 + $0xa8] sm:$0xff]   ;;  %s2984_s7 = smov (!%p231_p6, %s1732_s7), 15 }
  0x11   : > { %1880 = vmatpush3.bf16.msra.mxu1 %v2181_v7  ;;  %1817 = vmatprep.subr.bf16.mxu0 %v2182_v8  ;;  %s2133_s25 = smul.u32 432, %s2982_s13  ;;  %v2198_v24 = vld [vmem:[%s2968_s1 + $0x70] sm:$0xff]   ;;  %v2202_v28 = vld [vmem:[%s2968_s1 + $0x78] sm:$0xff]   ;;  %v2206_v40 = vld [vmem:[%s2968_s1 + $0x140] sm:$0xff]   ;;  %s1733_s12 = sshll.u32 %s2984_s7, 1 }
  0x12   : > { %1881 = vmatprep.subr.bf16.mxu1 %v2183_v9  ;;  %v2199_v25 = vld [vmem:[%s2968_s1 + $0xf0] sm:$0xff]   ;;  %v2203_v29 = vld [vmem:[%s2968_s1 + $0xf8] sm:$0xff]   ;;  %v2207_v46 = vld [vmem:[%s2968_s1 + $0x1c0] sm:$0xff]   ;;  %s1734_s8 = sshll.u32 %s2982_s13, 5 }
  0x13   : > { %v2200_v26 = vld [vmem:[%s2968_s1 + $0x30] sm:$0xff]   ;;  %s220_s10 = scalar_lea.vmem %s2967_s0, %s2133_s25  ;;  %v2204_v30 = vld [vmem:[%s2968_s1 + $0x38] sm:$0xff]   ;;  %v2208_v51 = vld [vmem:[%s2968_s1 + $0x100] sm:$0xff]   ;;  %s238_s9 = sadd.s32 %s1734_s8, %s1733_s12 }
  0x14   : > { %1818 = vmatpush3.bf16.msra.mxu0 %v2184_v10  ;;  %v2201_v27 = vld [vmem:[%s2968_s1 + $0xb0] sm:$0xff]   ;;  %s2439_s24 = scalar_lea.vmem %s220_s10, %s1737_s5  ;;  %v2205_v31 = vld [vmem:[%s2968_s1 + $0xb8] sm:$0xff]   ;;  %v2209_v58 = vld [vmem:[%s2968_s1 + $0x180] sm:$0xff]   ;;  %s1735_s10 = sshll.u32 %s238_s9, 3 }
  0x15   : > { %1882 = vmatpush3.bf16.msra.mxu1 %v2185_v11  ;;  %1819 = vmatprep.subr.bf16.mxu0 %v2186_v12  ;;  %v246_v32 = vld [vmem:[%s2439_s24] sm:$0xff]  ;;  %v247_v33 = vld [vmem:[%s2439_s24 + $0x8] sm:$0xff]  ;;  %v248_v34 = vld [vmem:[%s2439_s24 + $0x10] sm:$0x3]  ;;  %s2924_s11 = scalar_lea.vmem %s2970_s3, %s1735_s10 }
  0x16   : > { %1883 = vmatprep.subr.bf16.mxu1 %v2187_v13  ;;  %v276_v35 = vmax.f32 %v246_v32, 0.0  ;;  %v277_v36 = vmax.f32 %v247_v33, 0.0  ;;  %v278_v37 = vmax.f32 %v248_v34, 0.0  ;;  %v249_v38 = vld [vmem:[%s2439_s24 + $0x18] sm:$0xff]  ;;  %v250_v39 = vld [vmem:[%s2439_s24 + $0x20] sm:$0xff]  ;;  %v252_v0 = vld [vmem:[%s2439_s24 + $0x30] sm:$0xff] }
  0x17   : > { %v279_v41 = vmax.f32 %v249_v38, 0.0  ;;  %v280_v42 = vmax.f32 %v250_v39, 0.0  ;;  %v251_v59 = vld [vmem:[%s2439_s24 + $0x28] sm:$0x3]  ;;  %v253_v1 = vld [vmem:[%s2439_s24 + $0x38] sm:$0xff]  ;;  %v282_v4 = vmax.f32 %v252_v0, 0.0 }
  0x18   : > { %1820 = vmatpush3.bf16.msra.mxu0 %v2188_v14  ;;  %v331_v43 = vrot.slane %v276_v35, 1  ;;  %v332_v44 = vrot.slane %v277_v36, 1  ;;  %v334_v45 = vrot.slane %v278_v37, 1  ;;  %v388_v48 = vrot.slane %v276_v35, 2  ;;  %v2210_v3 = vld [vmem:[%s2968_s1 + $0x148] sm:$0xff]   ;;  %v2215_v33 = vld [vmem:[%s2968_s1 + $0x1d0] sm:$0xff]  }
  0x19   : > { %1884 = vmatpush3.bf16.msra.mxu1 %v2189_v15  ;;  %1821 = vmatprep.subr.bf16.mxu0 %v2190_v16  ;;  %v2458_v47 = vpack.c.bf16 %v280_v42, %v279_v41  ;;  %v389_v49 = vrot.slane %v277_v36, 2  ;;  %v391_v50 = vrot.slane %v278_v37, 2  ;;  %v478_v54 = vpack.c.bf16 %v277_v36, %v276_v35  ;;  %v2211_v7 = vld [vmem:[%s2968_s1 + $0x1c8] sm:$0xff]   ;;  %v2216_v34 = vld [vmem:[%s2968_s1 + $0x110] sm:$0xff]   ;;  %v257_v39 = vld [vmem:[%s2439_s24 + $0x58] sm:$0x3] }
  0x1a   : > { %1885 = vmatprep.subr.bf16.mxu1 %v2191_v17  ;;  %v333_v52 = vsel %vm330_vm0, %v331_v43, %v332_v44  ;;  %v335_v53 = vsel %vm330_vm0, %v332_v44, %v334_v45  ;;  %v336_v60 = vrot.slane %v279_v41, 1  ;;  %v281_v62 = vmax.f32 %v251_v59, 0.0  ;;  %v2212_v15 = vld [vmem:[%s2968_s1 + $0x108] sm:$0xff]   ;;  %v2217_v38 = vld [vmem:[%s2968_s1 + $0x190] sm:$0xff]   ;;  %v258_v45 = vld [vmem:[%s2439_s24 + $0x60] sm:$0xff] }
  0x1b   : > { %v479_v55 = vpack.c.bf16 %v335_v53, %v333_v52  ;;  %1220 = vmatprep.mubr.bf16.mxu1 %v2458_v47  ;;  %v390_v56 = vsel %vm387_vm1, %v388_v48, %v389_v49  ;;  %v392_v57 = vsel %vm387_vm1, %v389_v49, %v391_v50  ;;  %v337_v63 = vrot.slane %v280_v42, 1  ;;  %v2218_v53 = vld [vmem:[%s2968_s1 + $0x158] sm:$0xff]  }
  0x1c   : > { %1822 = vmatpush3.bf16.msra.mxu0 %v2192_v18  ;;  %v480_v61 = vpack.c.bf16 %v392_v57, %v390_v56  ;;  %v393_v2 = vrot.slane %v279_v41, 2  ;;  %v283_v5 = vmax.f32 %v253_v1, 0.0  ;;  %v394_v6 = vrot.slane %v280_v42, 2  ;;  %v2213_v18 = vld [vmem:[%s2968_s1 + $0x188] sm:$0xff]   ;;  %v2220_v59 = vld [vmem:[%s2968_s1 + $0x118] sm:$0xff]  }
  0x1d   : > { %1886 = vmatpush3.bf16.msra.mxu1 %v2193_v19  ;;  %1823 = vmatprep.subr.bf16.mxu0 %v2194_v20  ;;  %v338_v8 = vsel %vm330_vm0, %v336_v60, %v337_v63  ;;  %v339_v9 = vrot.slane %v281_v62, 1  ;;  %v396_v10 = vrot.slane %v281_v62, 2  ;;  %v341_v16 = vrot.slane %v282_v4, 1  ;;  %v254_v19 = vld [vmem:[%s2439_s24 + $0x40] sm:$0x3]  ;;  %v261_v1 = vld [vmem:[%s2439_s24 + $0x78] sm:$0xff] }
  0x1e   : > { %1887 = vmatprep.subr.bf16.mxu1 %v2195_v21  ;;  %1123 = vmatprep.mubr.bf16.mxu0 %v479_v55  ;;  %v2481_v11 = vpack.c.bf16 %v283_v5, %v282_v4  ;;  %v395_v12 = vsel %vm387_vm1, %v393_v2, %v394_v6  ;;  %v342_v20 = vrot.slane %v283_v5, 1  ;;  %v255_v21 = vld [vmem:[%s2439_s24 + $0x48] sm:$0xff]  ;;  %v287_v43 = vmax.f32 %v257_v39, 0.0  ;;  %v260_v62 = vld [vmem:[%s2439_s24 + $0x70] sm:$0x3] }
  0x1f   : > { %v340_v13 = vsel %vm330_vm0, %v337_v63, %v339_v9  ;;  %v397_v14 = vsel %vm387_vm1, %v394_v6, %v396_v10  ;;  %v290_v2 = vmax.f32 %v260_v62, 0.0  ;;  %v2223_v10 = vld [vmem:[%s2968_s1 + $0x1e0] sm:$0xff]  }
  0x20   : > { %1824 = vmatpush3.bf16.msra.mxu0 %v2196_v22  ;;  %v2489_v17 = vpack.c.bf16 %v340_v13, %v338_v8  ;;  %v398_v22 = vrot.slane %v282_v4, 2  ;;  %v2566_v4 = vmax.f32 %v261_v1, 0.0 }
  0x21   : > { %1888 = vmatpush3.bf16.msra.mxu1 %v2197_v23  ;;  %1825 = vmatprep.subr.bf16.mxu0 %v2198_v24  ;;  %v2497_v23 = vpack.c.bf16 %v397_v14, %v395_v12  ;;  %v284_v24 = vmax.f32 %v254_v19, 0.0  ;;  %v354_v8 = vrot.slane %v290_v2, 1  ;;  %v2224_v12 = vld [vmem:[%s2968_s1 + $0x120] sm:$0xff]  }
  0x22   : > { %1889 = vmatprep.subr.bf16.mxu1 %v2199_v25  ;;  %v256_v25 = vld [vmem:[%s2439_s24 + $0x50] sm:$0xff]  ;;  %v413_v39 = vrot.slane %v2566_v4, 2 }
  0x23   : > { %v401_v32 = vrot.slane %v284_v24, 2 }
  0x24   : > { %1826 = vmatpush3.bf16.msra.mxu0 %v2200_v26  ;;  %v2500_v26 = vmax.f32 %v255_v21, 0.0  ;;  %v411_v21 = vrot.slane %v290_v2, 2 }
  0x25   : > { %1890 = vmatpush3.bf16.msra.mxu1 %v2201_v27  ;;  %1827 = vmatprep.subr.bf16.mxu0 %v2202_v28  ;;  %v399_v27 = vrot.slane %v283_v5, 2  ;;  %v286_v28 = vmax.f32 %v256_v25, 0.0  ;;  %v2222_v5 = vld [vmem:[%s2968_s1 + $0x160] sm:$0xff]  }
  0x26   : > { %1891 = vmatprep.subr.bf16.mxu1 %v2203_v29  ;;  %v2214_v29 = vld [vmem:[%s2968_s1 + $0x150] sm:$0xff]   ;;  %v403_v49 = vrot.slane %v2500_v26, 2 }
  0x27   : > { %v2514_v35 = vpack.c.bf16 %v286_v28, %v2500_v26  ;;  %v400_v37 = vsel %vm387_vm1, %v398_v22, %v399_v27  ;;  %v402_v42 = vsel %vm387_vm1, %v399_v27, %v401_v32  ;;  %v347_v44 = vrot.slane %v286_v28, 1  ;;  %v2226_v32 = vld [vmem:[%s2968_s1 + $0x168] sm:$0xff]  }
  0x28   : > { %1828 = vmatpush3.bf16.msra.mxu0 %v2204_v30  ;;  %v343_v30 = vsel %vm330_vm0, %v341_v16, %v342_v20  ;;  %v404_v52 = vrot.slane %v286_v28, 2  ;;  %v2544_v55 = vpack.c.bf16 %v402_v42, %v400_v37  ;;  %v2225_v16 = vld [vmem:[%s2968_s1 + $0x1a0] sm:$0xff]   ;;  %v356_v27 = vrot.slane %v2566_v4, 1  ;;  %v2229_v42 = vld [vmem:[%s2968_s1 + $0x1a8] sm:$0xff]  }
  0x29   : > { %1892 = vmatpush3.bf16.msra.mxu1 %v2205_v31  ;;  %1941 = vmatprep.subr.bf16.mxu0 %v2206_v40  ;;  %v344_v31 = vrot.slane %v284_v24, 1  ;;  %v346_v40 = vrot.slane %v2500_v26, 1  ;;  %v264_v24 = vld [vmem:[%s2439_s24 + $0x90] sm:$0xff] }
  0x2a   : > { %2005 = vmatprep.subr.bf16.mxu1 %v2207_v46  ;;  %v259_v46 = vld [vmem:[%s2439_s24 + $0x68] sm:$0xff]  ;;  %v405_v6 = vsel %vm387_vm1, %v403_v49, %v404_v52  ;;  %v268_v49 = vld [vmem:[%s2439_s24 + $0xb0] sm:$0xff] }
  0x2b   : > { %1124 = vmatmul.mubr.bf16.vlgmr.msra.gmra.mrb[0].mxu0 %v478_v54  ;;  %v345_v36 = vsel %vm330_vm0, %v342_v20, %v344_v31  ;;  %v2533_v48 = vmax.f32 %v259_v46, 0.0  ;;  %v348_v50 = vsel %vm330_vm0, %v346_v40, %v347_v44  ;;  %v2219_v54 = vld [vmem:[%s2968_s1 + $0x1d8] sm:$0xff]   ;;  %v2603_v31 = vmax.f32 %v264_v24, 0.0 }
  0x2c   : > { %1221 = vmatmul.mubr.bf16.vlgmr.msra.gmra.mrb[0].mxu1 %v480_v61  ;;  %1942 = vmatpush3.bf16.msra.mxu0 %v2208_v51  ;;  %v2525_v41 = vpack.c.bf16 %v345_v36, %v343_v30  ;;  %v349_v51 = vrot.slane %v287_v43, 1  ;;  %v2221_v61 = vld [vmem:[%s2968_s1 + $0x198] sm:$0xff]   ;;  %v2228_v36 = vld [vmem:[%s2968_s1 + $0x128] sm:$0xff]   ;;  %v2657_v1 = vmax.f32 %v268_v49, 0.0 }
  0x2d   : > { %2006 = vmatpush3.bf16.msra.mxu1 %v2209_v58  ;;  %1943 = vmatprep.subr.bf16.mxu0 %v2210_v3  ;;  %v406_v58 = vrot.slane %v287_v43, 2  ;;  %v352_v0 = vrot.slane %v2533_v48, 1  ;;  %v262_v3 = vld [vmem:[%s2439_s24 + $0x80] sm:$0xff]  ;;  %v409_v20 = vrot.slane %v2533_v48, 2  ;;  %v418_v2 = vrot.slane %v2603_v31, 2  ;;  %v2237_v24 = vld [vmem:[%s2968_s1 + $0x1b8] sm:$0xff]  }
  0x2e   : > { %2007 = vmatprep.subr.bf16.mxu1 %v2211_v7  ;;  %1228 = vmatprep.mubr.bf16.mxu1 %v2481_v11  ;;  %v350_v56 = vsel %vm330_vm0, %v347_v44, %v349_v51  ;;  %v2575_v9 = vmax.f32 %v262_v3, 0.0  ;;  %v266_v43 = vld [vmem:[%s2439_s24 + $0xa0] sm:$0x3]  ;;  %v267_v44 = vld [vmem:[%s2439_s24 + $0xa8] sm:$0xff]  ;;  %v2230_v51 = vld [vmem:[%s2968_s1 + $0x170] sm:$0xff]  }
  0x2f   : > { %1131 = vmatprep.mubr.bf16.mxu0 %v2489_v17  ;;  %v2554_v60 = vpack.c.bf16 %v350_v56, %v348_v50  ;;  %v407_v7 = vsel %vm387_vm1, %v404_v52, %v406_v58  ;;  %v355_v14 = vsel %vm330_vm0, %v352_v0, %v354_v8  ;;  %v361_v50 = vrot.slane %v2603_v31, 1  ;;  %v2231_v56 = vld [vmem:[%s2968_s1 + $0x1f0] sm:$0xff]  }
  0x30   : > { %1944 = vmatpush3.bf16.msra.mxu0 %v2212_v15  ;;  %v2590_v19 = vpack.c.bf16 %v407_v7, %v405_v6  ;;  %v2598_v26 = vpack.c.bf16 %v2575_v9, %v2566_v4  ;;  %v357_v28 = vrot.slane %v2575_v9, 1  ;;  %v414_v40 = vrot.slane %v2575_v9, 2  ;;  %v2232_v58 = vld [vmem:[%s2968_s1 + $0x130] sm:$0xff]   ;;  %v270_v6 = vld [vmem:[%s2439_s24 + $0xc0] sm:$0xff]  ;;  %v271_v7 = vld [vmem:[%s2439_s24 + $0xc8] sm:$0xff] }
  0x31   : > { %2008 = vmatpush3.bf16.msra.mxu1 %v2213_v18  ;;  %1945 = vmatprep.subr.bf16.mxu0 %v2214_v29  ;;  %v263_v18 = vld [vmem:[%s2439_s24 + $0x88] sm:$0x3]  ;;  %v265_v29 = vld [vmem:[%s2439_s24 + $0x98] sm:$0xff] }
  0x32   : > { %2009 = vmatprep.subr.bf16.mxu1 %v2215_v33  ;;  %v293_v22 = vmax.f32 %v263_v18, 0.0  ;;  %v2227_v33 = vld [vmem:[%s2968_s1 + $0x1e8] sm:$0xff]   ;;  %v415_v8 = vsel %vm387_vm1, %v413_v39, %v414_v40  ;;  %v300_v18 = vmax.f32 %v270_v6, 0.0 }
  0x33   : > { %1132 = vmatmul.mubr.bf16.gmra.mrb[4].mxu0 %v2458_v47  ;;  %v2531_v47 = vmax.f32 %v258_v45, 0.0  ;;  %v358_v45 = vsel %vm330_vm0, %v356_v27, %v357_v28 }
  0x34   : > { %1229 = vmatmul.mubr.bf16.gmra.mrb[4].mxu1 %v2497_v23  ;;  %1946 = vmatpush3.bf16.msra.mxu0 %v2216_v34  ;;  %v359_v30 = vrot.slane %v293_v22, 1  ;;  %v2613_v34 = vmax.f32 %v265_v29, 0.0 }
  0x35   : > { %1236 = vmatprep.mubr.bf16.mxu1 %v2514_v35  ;;  %2010 = vmatpush3.bf16.msra.mxu1 %v2217_v38  ;;  %v2549_v57 = vpack.c.bf16 %v2533_v48, %v2531_v47  ;;  %v351_v63 = vrot.slane %v2531_v47, 1  ;;  %v408_v15 = vrot.slane %v2531_v47, 2  ;;  %v412_v38 = vsel %vm387_vm1, %v409_v20, %v411_v21 }
  0x36   : > { %1139 = vmatprep.mubr.bf16.mxu0 %v2525_v41  ;;  %1947 = vmatprep.subr.bf16.mxu0 %v2218_v53  ;;  %v360_v46 = vsel %vm330_vm0, %v357_v28, %v359_v30  ;;  %v416_v47 = vrot.slane %v293_v22, 2  ;;  %v296_v48 = vmax.f32 %v266_v43, 0.0  ;;  %v362_v53 = vrot.slane %v2613_v34, 1  ;;  %v2696_v30 = vld [vmem:[%s2968_s1 + $0x200] sm:$0xff]   ;;  %v272_v43 = vld [vmem:[%s2439_s24 + $0xd0] sm:$0x3] }
  0x37   : > { %2011 = vmatprep.subr.bf16.mxu1 %v2219_v54  ;;  %v353_v13 = vsel %vm330_vm0, %v351_v63, %v352_v0  ;;  %v410_v37 = vsel %vm387_vm1, %v408_v15, %v409_v20  ;;  %v2639_v54 = vmax.f32 %v267_v44, 0.0  ;;  %v2233_v63 = vld [vmem:[%s2968_s1 + $0x1b0] sm:$0xff]   ;;  %v269_v0 = vld [vmem:[%s2439_s24 + $0xb8] sm:$0x3]  ;;  %v419_v3 = vrot.slane %v2613_v34, 2 }
  0x38   : > { %1948 = vmatpush3.bf16.msra.mxu0 %v2220_v59  ;;  %v2594_v25 = vpack.c.bf16 %v355_v14, %v353_v13  ;;  %v2636_v52 = vpack.c.bf16 %v412_v38, %v410_v37  ;;  %v2647_v59 = vpack.c.bf16 %v360_v46, %v358_v45  ;;  %v364_v62 = vrot.slane %v296_v48, 1  ;;  %v2234_v13 = vld [vmem:[%s2968_s1 + $0x178] sm:$0xff]  }
  0x39   : > { %2012 = vmatpush3.bf16.msra.mxu1 %v2221_v61  ;;  %1949 = vmatprep.subr.bf16.mxu0 %v2222_v5  ;;  %v2651_v61 = vpack.c.bf16 %v2613_v34, %v2603_v31  ;;  %v421_v4 = vrot.slane %v296_v48, 2  ;;  %v366_v5 = vrot.slane %v2639_v54, 1  ;;  %v417_v9 = vsel %vm387_vm1, %v414_v40, %v416_v47  ;;  %v2235_v14 = vld [vmem:[%s2968_s1 + $0x1f8] sm:$0xff]  }
  0x3a   : > { %2013 = vmatprep.subr.bf16.mxu1 %v2223_v10  ;;  %v299_v10 = vmax.f32 %v269_v0, 0.0  ;;  %v363_v15 = vsel %vm330_vm0, %v361_v50, %v362_v53  ;;  %v2236_v20 = vld [vmem:[%s2968_s1 + $0x138] sm:$0xff]   ;;  %v2682_v21 = vpack.c.bf16 %v417_v9, %v415_v8  ;;  %v301_v22 = vmax.f32 %v271_v7, 0.0 }
  0x3b   : > { %1140 = vmatmul.mubr.bf16.gmra.mrb[8].mxu0 %v2481_v11  ;;  %v2691_v28 = vpack.c.bf16 %v2657_v1, %v2639_v54  ;;  %v420_v31 = vsel %vm387_vm1, %v418_v2, %v419_v3  ;;  %v424_v45 = vrot.slane %v2657_v1, 2  ;;  %v302_v47 = vmax.f32 %v272_v43, 0.0  ;;  %v273_v48 = vld [vmem:[%s2439_s24 + $0xd8] sm:$0xff] }
  0x3c   : > { %1237 = vmatmul.mubr.bf16.gmra.mrb[8].mxu1 %v2544_v55  ;;  %1147 = vmatprep.mubr.bf16.mxu0 %v2554_v60  ;;  %v369_v29 = vrot.slane %v299_v10, 1  ;;  %v448_v34 = vrot.slane %v301_v22, 1  ;;  %v455_v37 = vrot.slane %v301_v22, 2  ;;  %v2712_v44 = vpack.c.bf16 %v301_v22, %v300_v18 }
  0x3d   : > { %1244 = vmatprep.mubr.bf16.mxu1 %v2549_v57  ;;  %1950 = vmatpush3.bf16.msra.mxu0 %v2224_v12  ;;  %v367_v12 = vrot.slane %v2657_v1, 1  ;;  %v426_v46 = vrot.slane %v299_v10, 2 }
  0x3e   : > { %2014 = vmatpush3.bf16.msra.mxu1 %v2225_v16  ;;  %1951 = vmatprep.subr.bf16.mxu0 %v2226_v32  ;;  %v365_v16 = vsel %vm330_vm0, %v362_v53, %v364_v62  ;;  %v422_v32 = vsel %vm387_vm1, %v419_v3, %v421_v4  ;;  %v274_v53 = vld [vmem:[%s2439_s24 + $0xe0] sm:$0xff]  ;;  %v450_v62 = vrot.slane %v302_v47, 1 }
  0x3f   : > { %2015 = vmatprep.subr.bf16.mxu1 %v2227_v33  ;;  %v2687_v27 = vpack.c.bf16 %v365_v16, %v363_v15  ;;  %v447_v33 = vrot.slane %v300_v18, 1  ;;  %v368_v38 = vsel %vm330_vm0, %v366_v5, %v367_v12  ;;  %v370_v39 = vsel %vm330_vm0, %v367_v12, %v369_v29  ;;  %v2239_v29 = vld [vmem:[%s2968_s1 + $0x208] sm:$0xff]  }
  0x40   : > { %v2708_v40 = vpack.c.bf16 %v422_v32, %v420_v31  ;;  %v2716_v49 = vpack.c.bf16 %v370_v39, %v368_v38  ;;  %v451_v3 = vsel %vm330_vm0, %v448_v34, %v450_v62  ;;  %v427_v12 = vsel %vm387_vm1, %v424_v45, %v426_v46 }
  0x41   : > { %1952 = vmatpush3.bf16.msra.mxu0 %v2228_v36  ;;  %v454_v36 = vrot.slane %v300_v18, 2  ;;  %v449_v50 = vsel %vm330_vm0, %v447_v33, %v448_v34 }
  0x42   : > { %2016 = vmatpush3.bf16.msra.mxu1 %v2229_v42  ;;  %1953 = vmatprep.subr.bf16.mxu0 %v2230_v51  ;;  %v423_v42 = vrot.slane %v2639_v54, 2  ;;  %v457_v54 = vrot.slane %v302_v47, 2  ;;  %v2734_v8 = vpack.c.bf16 %v451_v3, %v449_v50 }
  0x43   : > { %1148 = vmatmul.mubr.bf16.gmra.mrb[12].mxu0 %v2514_v35  ;;  %2017 = vmatprep.subr.bf16.mxu1 %v2231_v56  ;;  %v456_v51 = vsel %vm387_vm1, %v454_v36, %v455_v37  ;;  %v275_v56 = vld [vmem:[%s2439_s24 + $0xe8] sm:$0x3] }
  0x44   : > { %1245 = vmatmul.mubr.bf16.gmra.mrb[12].mxu1 %v2590_v19  ;;  %1155 = vmatprep.mubr.bf16.mxu0 %v2594_v25  ;;  %v305_v0 = vmax.f32 %v275_v56, 0.0  ;;  %v458_v4 = vsel %vm387_vm1, %v455_v37, %v457_v54  ;;  %v425_v7 = vsel %vm387_vm1, %v423_v42, %v424_v45 }
  0x45   : > { %1252 = vmatprep.mubr.bf16.mxu1 %v2598_v26  ;;  %1954 = vmatpush3.bf16.msra.mxu0 %v2232_v58  ;;  %v2722_v58 = vmax.f32 %v273_v48, 0.0  ;;  %v2736_v9 = vpack.c.bf16 %v458_v4, %v456_v51  ;;  %v2756_v22 = vpack.c.bf16 %v427_v12, %v425_v7 }
  0x46   : > { %2018 = vmatpush3.bf16.msra.mxu1 %v2233_v63  ;;  %1955 = vmatprep.subr.bf16.mxu0 %v2234_v13  ;;  %v2724_v63 = vmax.f32 %v274_v53, 0.0  ;;  %v467_v6 = vrot.slane %v305_v0, 1  ;;  %v474_v15 = vrot.slane %v305_v0, 2 }
  0x47   : > { %2019 = vmatprep.subr.bf16.mxu1 %v2235_v14  ;;  %v464_v1 = vrot.slane %v2722_v58, 1  ;;  %v471_v2 = vrot.slane %v2722_v58, 2 }
  0x48   : > { %v465_v5 = vrot.slane %v2724_v63, 1  ;;  %v472_v10 = vrot.slane %v2724_v63, 2 }
  0x49   : > { %1956 = vmatpush3.bf16.msra.mxu0 %v2236_v20 }
  0x4a   : > { %2020 = vmatpush3.bf16.msra.mxu1 %v2237_v24  ;;  %2085 = vmatprep.subr.bf16.mxu0 %v2696_v30  ;;  %v2743_v13 = vsel %vm330_vm0, %v464_v1, %v465_v5  ;;  %v2746_v14 = vsel %vm330_vm0, %v465_v5, %v467_v6  ;;  %v2751_v18 = vsel %vm387_vm1, %v471_v2, %v472_v10 }
  0x4b   : > { %1156 = vmatmul.mubr.bf16.gmra.mrb[16].mxu0 %v2549_v57  ;;  %2117 = vmatprep.subr.bf16.mxu1 %v2696_v30  ;;  %v506_v16 = vpack.c.bf16 %v2746_v14, %v2743_v13  ;;  %v2754_v20 = vsel %vm387_vm1, %v472_v10, %v474_v15 }
  0x4c   : > { %1253 = vmatmul.mubr.bf16.gmra.mrb[16].mxu1 %v2636_v52  ;;  %1163 = vmatprep.mubr.bf16.mxu0 %v2647_v59  ;;  %v507_v24 = vpack.c.bf16 %v2754_v20, %v2751_v18 }
  0x4d   : > { %1260 = vmatprep.mubr.bf16.mxu1 %v2651_v61 }
  0x53   : > { %1164 = vmatmul.mubr.bf16.gmra.mrb[20].mxu0 %v2598_v26 }
  0x54   : > { %1261 = vmatmul.mubr.bf16.gmra.mrb[20].mxu1 %v2682_v21  ;;  %1171 = vmatprep.mubr.bf16.mxu0 %v2687_v27 }
  0x55   : > { %1268 = vmatprep.mubr.bf16.mxu1 %v2691_v28 }
  0x5b   : > { %1172 = vmatmul.mubr.bf16.gmra.mrb[24].mxu0 %v2651_v61 }
  0x5c   : > { %1269 = vmatmul.mubr.bf16.gmra.mrb[24].mxu1 %v2708_v40  ;;  %1179 = vmatprep.mubr.bf16.mxu0 %v2716_v49 }
  0x5d   : > { %1276 = vmatprep.mubr.bf16.mxu1 %v2712_v44 }
  0x63   : > { %1180 = vmatmul.mubr.bf16.gmra.mrb[28].mxu0 %v2691_v28 }
  0x64   : > { %1277 = vmatmul.mubr.bf16.gmra.mrb[28].mxu1 %v2756_v22  ;;  %1317 = vmatprep.mubr.bf16.mxu0 %v2497_v23  ;;  %v2240_v23 = vld [vmem:[%s2968_s1 + $0x210] sm:$0xff]  }
  0x65   : > { %1414 = vmatprep.mubr.bf16.mxu1 %v2525_v41 }
  0x6b   : > { %1318 = vmatmul.mubr.bf16.vlgmr.msra.gmra.mrb[32].mxu0 %v2489_v17  ;;  %v2242_v17 = vld [vmem:[%s2968_s1 + $0x220] sm:$0xff]  }
  0x6c   : > { %1415 = vmatmul.mubr.bf16.vlgmr.msra.gmra.mrb[32].mxu1 %v2481_v11  ;;  %2086 = vmatpush3.bf16.msra.mxu0 %v2696_v30  ;;  %v2241_v11 = vld [vmem:[%s2968_s1 + $0x218] sm:$0xff]  }
  0x6d   : > { %2125 = vmatpush3.bf16.msra.mxu1 %v2696_v30  ;;  %1325 = vmatprep.mubr.bf16.mxu0 %v2544_v55 }
  0x6e   : > { %1422 = vmatprep.mubr.bf16.mxu1 %v2554_v60  ;;  %2087 = vmatprep.subr.bf16.mxu0 %v2239_v29 }
  0x6f   : > { %2118 = vmatprep.subr.bf16.mxu1 %v2239_v29 }
  0x70   : > { %2088 = vmatpush3.bf16.msra.mxu0 %v2239_v29 }
  0x71   : > { %2126 = vmatpush3.bf16.msra.mxu1 %v2239_v29  ;;  %2089 = vmatprep.subr.bf16.mxu0 %v2240_v23 }
  0x72   : > { %2119 = vmatprep.subr.bf16.mxu1 %v2240_v23 }
  0x73   : > { %1326 = vmatmul.mubr.bf16.gmra.mrb[36].mxu0 %v2525_v41  ;;  %v2244_v41 = vld [vmem:[%s2968_s1 + $0x230] sm:$0xff]  }
  0x74   : > { %1423 = vmatmul.mubr.bf16.gmra.mrb[36].mxu1 %v2514_v35  ;;  %1333 = vmatprep.mubr.bf16.mxu0 %v2590_v19  ;;  %v2243_v35 = vld [vmem:[%s2968_s1 + $0x228] sm:$0xff]  }
  0x75   : > { %1430 = vmatprep.mubr.bf16.mxu1 %v2594_v25  ;;  %2090 = vmatpush3.bf16.msra.mxu0 %v2240_v23 }
  0x76   : > { %2127 = vmatpush3.bf16.msra.mxu1 %v2240_v23  ;;  %2091 = vmatprep.subr.bf16.mxu0 %v2241_v11 }
  0x77   : > { %2120 = vmatprep.subr.bf16.mxu1 %v2241_v11 }
  0x79   : > { %2092 = vmatpush3.bf16.msra.mxu0 %v2241_v11 }
  0x7a   : > { %2128 = vmatpush3.bf16.msra.mxu1 %v2241_v11  ;;  %2093 = vmatprep.subr.bf16.mxu0 %v2242_v17 }
  0x7b   : > { %2121 = vmatprep.subr.bf16.mxu1 %v2242_v17  ;;  %1334 = vmatmul.mubr.bf16.gmra.mrb[40].mxu0 %v2554_v60  ;;  %v505_v60 = vpack.c.bf16 %v2724_v63, %v2722_v58 }
  0x7c   : > { %1431 = vmatmul.mubr.bf16.gmra.mrb[40].mxu1 %v2549_v57  ;;  %1341 = vmatprep.mubr.bf16.mxu0 %v2636_v52  ;;  %v2245_v57 = vld [vmem:[%s2968_s1 + $0x238] sm:$0xff]  }
  0x7d   : > { %1438 = vmatprep.mubr.bf16.mxu1 %v2647_v59  ;;  %2094 = vmatpush3.bf16.msra.mxu0 %v2242_v17 }
  0x7e   : > { %2129 = vmatpush3.bf16.msra.mxu1 %v2242_v17  ;;  %2095 = vmatprep.subr.bf16.mxu0 %v2243_v35 }
  0x7f   : > { %2122 = vmatprep.subr.bf16.mxu1 %v2243_v35 }
  0x81   : > { %2096 = vmatpush3.bf16.msra.mxu0 %v2243_v35 }
  0x82   : > { %2130 = vmatpush3.bf16.msra.mxu1 %v2243_v35  ;;  %2097 = vmatprep.subr.bf16.mxu0 %v2244_v41 }
  0x83   : > { %2123 = vmatprep.subr.bf16.mxu1 %v2244_v41  ;;  %1342 = vmatmul.mubr.bf16.gmra.mrb[44].mxu0 %v2594_v25 }
  0x84   : > { %1439 = vmatmul.mubr.bf16.gmra.mrb[44].mxu1 %v2598_v26  ;;  %1349 = vmatprep.mubr.bf16.mxu0 %v2682_v21 }
  0x85   : > { %1446 = vmatprep.mubr.bf16.mxu1 %v2687_v27  ;;  %2098 = vmatpush3.bf16.msra.mxu0 %v2244_v41 }
  0x86   : > { %2131 = vmatpush3.bf16.msra.mxu1 %v2244_v41  ;;  %2099 = vmatprep.subr.bf16.mxu0 %v2245_v57 }
  0x87   : > { %2124 = vmatprep.subr.bf16.mxu1 %v2245_v57 }
  0x89   : > { %2100 = vmatpush3.bf16.msra.mxu0 %v2245_v57 }
  0x8a   : > { %2132 = vmatpush3.bf16.msra.mxu1 %v2245_v57 }
  0x8b   : > { %1350 = vmatmul.mubr.bf16.gmra.mrb[48].mxu0 %v2647_v59 }
  0x8c   : > { %1447 = vmatmul.mubr.bf16.gmra.mrb[48].mxu1 %v2651_v61  ;;  %1357 = vmatprep.mubr.bf16.mxu0 %v2708_v40 }
  0x8d   : > { %1454 = vmatprep.mubr.bf16.mxu1 %v2716_v49 }
  0x93   : > { %1358 = vmatmul.mubr.bf16.gmra.mrb[52].mxu0 %v2687_v27 }
  0x94   : > { %1455 = vmatmul.mubr.bf16.gmra.mrb[52].mxu1 %v2691_v28  ;;  %1365 = vmatprep.mubr.bf16.mxu0 %v2756_v22 }
  0x95   : > { %1462 = vmatprep.mubr.bf16.mxu1 %v2734_v8 }
  0x9b   : > { %1366 = vmatmul.mubr.bf16.gmra.mrb[56].mxu0 %v2716_v49 }
  0x9c   : > { %1463 = vmatmul.mubr.bf16.gmra.mrb[56].mxu1 %v2712_v44  ;;  %1373 = vmatprep.mubr.bf16.mxu0 %v2736_v9 }
  0x9d   : > { %1470 = vmatprep.mubr.bf16.mxu1 %v506_v16 }
  0xa3   : > { %1374 = vmatmul.mubr.bf16.gmra.mrb[60].mxu0 %v2734_v8 }
  0xa4   : > { %1471 = vmatmul.mubr.bf16.gmra.mrb[60].mxu1 %v505_v60  ;;  %2101 = vmatprep.mubr.bf16.mxu0 %v2544_v55  ;;  %v2833_v55 = vld [vmem:[%s2969_s2] ss:$0 sm:$0xff] }
  0xa5   : > { %2109 = vmatprep.mubr.bf16.mxu1 %v2708_v40 }
  0xab   : > { %2102 = vmatmul.mubr.bf16.vlgmr.msra.gmra.mrb[64].mxu0 %v2590_v19 }
  0xac   : > { %2110 = vmatmul.mubr.bf16.vlgmr.msra.gmra.mrb[64].mxu1 %v2756_v22  ;;  %2105 = vmatprep.mubr.bf16.mxu0 %v2636_v52 }
  0xad   : > { %2113 = vmatprep.mubr.bf16.mxu1 %v2736_v9 }
  0xb3   : > { %2106 = vmatmul.mubr.bf16.gmra.mrb[68].mxu0 %v2682_v21 }
  0xb4   : > { %2114 = vmatmul.mubr.bf16.gmra.mrb[68].mxu1 %v507_v24 }
  0xfe   : > { %v1829_v25 = vpop.f32.mrb[0].mxu0 }
  0xff   : > { %v1893_v26 = vpop.f32.mrb[0].mxu1  ;;  %v1830_v19 = vpop.f32.mrb[1].mxu0 }
 0x100   : > { %v1894_v59 = vpop.f32.mrb[1].mxu1  ;;  %v1831_v61 = vadd.f32 %v1830_v19, %v1829_v25  ;;  %v1832_v52 = vpop.f32.mrb[2].mxu0 }
 0x101   : > { %v1895_v27 = vadd.f32 %v1894_v59, %v1893_v26  ;;  %v1896_v28 = vpop.f32.mrb[2].mxu1  ;;  %v1833_v30 = vpop.f32.mrb[3].mxu0 }
 0x102   : > { %v1897_v31 = vpop.f32.mrb[3].mxu1  ;;  %v1126_v21 = vadd.f32 %v1831_v61, %v2833_v55  ;;  %v1834_v32 = vadd.f32 %v1833_v30, %v1832_v52 }
 0x103   : > { %v1898_v33 = vadd.f32 %v1897_v31, %v1896_v28 }
 0x104   : > { %v2836_v34 = vadd.f32 %v1895_v27, %v1126_v21  ;;  %v1129_v36 = vadd.f32 %v1834_v32, %v2833_v55 }
 0x106   : > { %v2839_v37 = vadd.f32 %v1898_v33, %v1129_v36  ;;  %v1835_v38 = vpop.f32.mrb[4].mxu0 }
 0x107   : > { %v1899_v39 = vpop.f32.mrb[4].mxu1  ;;  %v1836_v40 = vpop.f32.mrb[5].mxu0 }
 0x108   : > { %v1900_v42 = vpop.f32.mrb[5].mxu1  ;;  %v1837_v43 = vadd.f32 %v1836_v40, %v1835_v38  ;;  %v1838_v45 = vpop.f32.mrb[6].mxu0 }
 0x109   : > { %v1901_v44 = vadd.f32 %v1900_v42, %v1899_v39  ;;  %v1902_v46 = vpop.f32.mrb[6].mxu1  ;;  %v1839_v47 = vpop.f32.mrb[7].mxu0 }
 0x10a   : > { %v1903_v48 = vpop.f32.mrb[7].mxu1  ;;  %v1134_v49 = vadd.f32 %v1837_v43, %v2833_v55  ;;  %v1840_v50 = vadd.f32 %v1839_v47, %v1838_v45 }
 0x10b   : > { %v1904_v51 = vadd.f32 %v1903_v48, %v1902_v46 }
 0x10c   : > { %v2842_v53 = vadd.f32 %v1901_v44, %v1134_v49  ;;  %v1137_v56 = vadd.f32 %v1840_v50, %v2833_v55 }
 0x10e   : > { %v2845_v58 = vadd.f32 %v1904_v51, %v1137_v56  ;;  %v1841_v62 = vpop.f32.mrb[8].mxu0 }
 0x10f   : > { %v1905_v54 = vpop.f32.mrb[8].mxu1  ;;  %v1842_v63 = vpop.f32.mrb[9].mxu0 }
 0x110   : > { %v1906_v0 = vpop.f32.mrb[9].mxu1  ;;  %v1843_v1 = vadd.f32 %v1842_v63, %v1841_v62  ;;  %v1844_v3 = vpop.f32.mrb[10].mxu0 }
 0x111   : > { %v1907_v2 = vadd.f32 %v1906_v0, %v1905_v54  ;;  %v1908_v4 = vpop.f32.mrb[10].mxu1  ;;  %v1845_v5 = vpop.f32.mrb[11].mxu0 }
 0x112   : > { %v1909_v6 = vpop.f32.mrb[11].mxu1  ;;  %v1142_v7 = vadd.f32 %v1843_v1, %v2833_v55  ;;  %v1846_v8 = vadd.f32 %v1845_v5, %v1844_v3 }
 0x113   : > { %v1910_v9 = vadd.f32 %v1909_v6, %v1908_v4 }
 0x114   : > { %v2848_v10 = vadd.f32 %v1907_v2, %v1142_v7  ;;  %v1145_v12 = vadd.f32 %v1846_v8, %v2833_v55 }
 0x116   : > { %v2851_v13 = vadd.f32 %v1910_v9, %v1145_v12  ;;  %v1847_v14 = vpop.f32.mrb[12].mxu0 }
 0x117   : > { %v1911_v15 = vpop.f32.mrb[12].mxu1  ;;  %v1848_v16 = vpop.f32.mrb[13].mxu0 }
 0x118   : > { %v1912_v18 = vpop.f32.mrb[13].mxu1  ;;  %v1849_v20 = vadd.f32 %v1848_v16, %v1847_v14  ;;  %v1850_v24 = vpop.f32.mrb[14].mxu0 }
 0x119   : > { %v1913_v22 = vadd.f32 %v1912_v18, %v1911_v15  ;;  %v1914_v29 = vpop.f32.mrb[14].mxu1  ;;  %v1851_v23 = vpop.f32.mrb[15].mxu0 }
 0x11a   : > { %v1915_v11 = vpop.f32.mrb[15].mxu1  ;;  %v1150_v17 = vadd.f32 %v1849_v20, %v2833_v55  ;;  %v1852_v35 = vadd.f32 %v1851_v23, %v1850_v24 }
 0x11b   : > { %v1916_v41 = vadd.f32 %v1915_v11, %v1914_v29 }
 0x11c   : > { %v2854_v57 = vadd.f32 %v1913_v22, %v1150_v17  ;;  %v1153_v60 = vadd.f32 %v1852_v35, %v2833_v55 }
 0x11e   : > { %v2857_v25 = vadd.f32 %v1916_v41, %v1153_v60  ;;  %v1853_v26 = vpop.f32.mrb[16].mxu0 }
 0x11f   : > { %v1917_v19 = vpop.f32.mrb[16].mxu1  ;;  %v1854_v59 = vpop.f32.mrb[17].mxu0 }
 0x120   : > { %v1918_v61 = vpop.f32.mrb[17].mxu1  ;;  %v1855_v27 = vadd.f32 %v1854_v59, %v1853_v26  ;;  %v1856_v28 = vpop.f32.mrb[18].mxu0 }
 0x121   : > { %v1919_v52 = vadd.f32 %v1918_v61, %v1917_v19  ;;  %v1920_v30 = vpop.f32.mrb[18].mxu1  ;;  %v1857_v31 = vpop.f32.mrb[19].mxu0 }
 0x122   : > { %v1921_v21 = vpop.f32.mrb[19].mxu1  ;;  %v1158_v32 = vadd.f32 %v1855_v27, %v2833_v55  ;;  %v1858_v33 = vadd.f32 %v1857_v31, %v1856_v28 }
 0x123   : > { %v1922_v36 = vadd.f32 %v1921_v21, %v1920_v30 }
 0x124   : > { %v2860_v38 = vadd.f32 %v1919_v52, %v1158_v32  ;;  %v1161_v39 = vadd.f32 %v1858_v33, %v2833_v55 }
 0x126   : > { %v2863_v40 = vadd.f32 %v1922_v36, %v1161_v39  ;;  %v1859_v42 = vpop.f32.mrb[20].mxu0 }
 0x127   : > { %v1923_v43 = vpop.f32.mrb[20].mxu1  ;;  %v1860_v44 = vpop.f32.mrb[21].mxu0 }
 0x128   : > { %v1924_v45 = vpop.f32.mrb[21].mxu1  ;;  %v1861_v46 = vadd.f32 %v1860_v44, %v1859_v42  ;;  %v1862_v48 = vpop.f32.mrb[22].mxu0 }
 0x129   : > { %v1925_v47 = vadd.f32 %v1924_v45, %v1923_v43  ;;  %v1926_v49 = vpop.f32.mrb[22].mxu1  ;;  %v1863_v50 = vpop.f32.mrb[23].mxu0 }
 0x12a   : > { %v1927_v51 = vpop.f32.mrb[23].mxu1  ;;  %v1166_v56 = vadd.f32 %v1861_v46, %v2833_v55  ;;  %v1864_v62 = vadd.f32 %v1863_v50, %v1862_v48 }
 0x12b   : > { %v1928_v54 = vadd.f32 %v1927_v51, %v1926_v49 }
 0x12c   : > { %v2866_v63 = vadd.f32 %v1925_v47, %v1166_v56  ;;  %v1169_v0 = vadd.f32 %v1864_v62, %v2833_v55 }
 0x12e   : > { %v2869_v1 = vadd.f32 %v1928_v54, %v1169_v0  ;;  %v1865_v2 = vpop.f32.mrb[24].mxu0 }
 0x12f   : > { %v1929_v3 = vpop.f32.mrb[24].mxu1  ;;  %v1866_v4 = vpop.f32.mrb[25].mxu0 }
 0x130   : > { %v1930_v5 = vpop.f32.mrb[25].mxu1  ;;  %v1867_v6 = vadd.f32 %v1866_v4, %v1865_v2  ;;  %v1868_v8 = vpop.f32.mrb[26].mxu0 }
 0x131   : > { %v1931_v7 = vadd.f32 %v1930_v5, %v1929_v3  ;;  %v1932_v9 = vpop.f32.mrb[26].mxu1  ;;  %v1869_v12 = vpop.f32.mrb[27].mxu0 }
 0x132   : > { %v1933_v14 = vpop.f32.mrb[27].mxu1  ;;  %v1174_v15 = vadd.f32 %v1867_v6, %v2833_v55  ;;  %v1870_v16 = vadd.f32 %v1869_v12, %v1868_v8 }
 0x133   : > { %v1934_v18 = vadd.f32 %v1933_v14, %v1932_v9 }
 0x134   : > { %v2872_v20 = vadd.f32 %v1931_v7, %v1174_v15  ;;  %v1177_v22 = vadd.f32 %v1870_v16, %v2833_v55 }
 0x136   : > { %v2875_v24 = vadd.f32 %v1934_v18, %v1177_v22  ;;  %v1871_v29 = vpop.f32.mrb[28].mxu0 }
 0x137   : > { %v1935_v23 = vpop.f32.mrb[28].mxu1  ;;  %v1872_v11 = vpop.f32.mrb[29].mxu0 }
 0x138   : > { %v1936_v17 = vpop.f32.mrb[29].mxu1  ;;  %v1873_v35 = vadd.f32 %v1872_v11, %v1871_v29  ;;  %v1874_v60 = vpop.f32.mrb[30].mxu0 }
 0x139   : > { %v1937_v41 = vadd.f32 %v1936_v17, %v1935_v23  ;;  %v1938_v26 = vpop.f32.mrb[30].mxu1  ;;  %v1875_v19 = vpop.f32.mrb[31].mxu0 }
 0x13a   : > { %v1939_v59 = vpop.f32.mrb[31].mxu1  ;;  %v1182_v61 = vadd.f32 %v1873_v35, %v2833_v55  ;;  %v1876_v27 = vadd.f32 %v1875_v19, %v1874_v60 }
 0x13b   : > { %v1940_v52 = vadd.f32 %v1939_v59, %v1938_v26 }
 0x13c   : > { %v2878_v28 = vadd.f32 %v1937_v41, %v1182_v61  ;;  %v1185_v30 = vadd.f32 %v1876_v27, %v2833_v55 }
 0x13e   : > { %v2881_v31 = vadd.f32 %v1940_v52, %v1185_v30  ;;  %v1957_v21 = vpop.f32.mrb[32].mxu0 }
 0x13f   : > { %v2021_v32 = vpop.f32.mrb[32].mxu1  ;;  %v1958_v33 = vpop.f32.mrb[33].mxu0 }
 0x140   : > { %v2022_v36 = vpop.f32.mrb[33].mxu1  ;;  %v1959_v39 = vadd.f32 %v1958_v33, %v1957_v21  ;;  %v1960_v43 = vpop.f32.mrb[34].mxu0 }
 0x141   : > { %v2023_v42 = vadd.f32 %v2022_v36, %v2021_v32  ;;  %v2024_v44 = vpop.f32.mrb[34].mxu1  ;;  %v1961_v45 = vpop.f32.mrb[35].mxu0 }
 0x142   : > { %v2025_v46 = vpop.f32.mrb[35].mxu1  ;;  %v1320_v47 = vadd.f32 %v1959_v39, %v2836_v34  ;;  %v1962_v48 = vadd.f32 %v1961_v45, %v1960_v43 }
 0x143   : > { %v2026_v49 = vadd.f32 %v2025_v46, %v2024_v44 }
 0x144   : > { %v1323_v50 = vadd.f32 %v1962_v48, %v2839_v37  ;;  %v2885_v51 = vadd.f32 %v2023_v42, %v1320_v47 }
 0x146   : > { %v1963_v55 = vpop.f32.mrb[36].mxu0  ;;  %v2887_v62 = vadd.f32 %v2026_v49, %v1323_v50 }
 0x147   : > { %v2027_v56 = vpop.f32.mrb[36].mxu1  ;;  %v1964_v54 = vpop.f32.mrb[37].mxu0 }
 0x148   : > { %v2028_v0 = vpop.f32.mrb[37].mxu1  ;;  %v1965_v2 = vadd.f32 %v1964_v54, %v1963_v55  ;;  %v1966_v4 = vpop.f32.mrb[38].mxu0 }
 0x149   : > { %v2029_v3 = vadd.f32 %v2028_v0, %v2027_v56  ;;  %v2030_v5 = vpop.f32.mrb[38].mxu1  ;;  %v1967_v6 = vpop.f32.mrb[39].mxu0 }
 0x14a   : > { %v2031_v7 = vpop.f32.mrb[39].mxu1  ;;  %v1328_v34 = vadd.f32 %v1965_v2, %v2842_v53  ;;  %v1968_v8 = vadd.f32 %v1967_v6, %v1966_v4 }
 0x14b   : > { %v2032_v9 = vadd.f32 %v2031_v7, %v2030_v5 }
 0x14c   : > { %v1331_v37 = vadd.f32 %v1968_v8, %v2845_v58  ;;  %v2891_v12 = vadd.f32 %v2029_v3, %v1328_v34 }
 0x14e   : > { %v1969_v14 = vpop.f32.mrb[40].mxu0  ;;  %v2893_v16 = vadd.f32 %v2032_v9, %v1331_v37 }
 0x14f   : > { %v2033_v15 = vpop.f32.mrb[40].mxu1  ;;  %v1970_v18 = vpop.f32.mrb[41].mxu0 }
 0x150   : > { %v2034_v22 = vpop.f32.mrb[41].mxu1  ;;  %v1971_v29 = vadd.f32 %v1970_v18, %v1969_v14  ;;  %v1972_v11 = vpop.f32.mrb[42].mxu0 }
 0x151   : > { %v2035_v23 = vadd.f32 %v2034_v22, %v2033_v15  ;;  %v2036_v17 = vpop.f32.mrb[42].mxu1  ;;  %v1973_v35 = vpop.f32.mrb[43].mxu0 }
 0x152   : > { %v2037_v41 = vpop.f32.mrb[43].mxu1  ;;  %v1336_v53 = vadd.f32 %v1971_v29, %v2848_v10  ;;  %v1974_v60 = vadd.f32 %v1973_v35, %v1972_v11 }
 0x153   : > { %v2038_v26 = vadd.f32 %v2037_v41, %v2036_v17 }
 0x154   : > { %v1339_v58 = vadd.f32 %v1974_v60, %v2851_v13  ;;  %v2897_v19 = vadd.f32 %v2035_v23, %v1336_v53 }
 0x156   : > { %v1975_v59 = vpop.f32.mrb[44].mxu0  ;;  %v2899_v27 = vadd.f32 %v2038_v26, %v1339_v58 }
 0x157   : > { %v2039_v61 = vpop.f32.mrb[44].mxu1  ;;  %v1976_v52 = vpop.f32.mrb[45].mxu0 }
 0x158   : > { %v2040_v30 = vpop.f32.mrb[45].mxu1  ;;  %v1977_v21 = vadd.f32 %v1976_v52, %v1975_v59  ;;  %v1978_v33 = vpop.f32.mrb[46].mxu0 }
 0x159   : > { %v2041_v32 = vadd.f32 %v2040_v30, %v2039_v61  ;;  %v2042_v36 = vpop.f32.mrb[46].mxu1  ;;  %v1979_v39 = vpop.f32.mrb[47].mxu0 }
 0x15a   : > { %v2043_v42 = vpop.f32.mrb[47].mxu1  ;;  %v1344_v10 = vadd.f32 %v1977_v21, %v2854_v57  ;;  %v1980_v43 = vadd.f32 %v1979_v39, %v1978_v33 }
 0x15b   : > { %v2044_v44 = vadd.f32 %v2043_v42, %v2042_v36 }
 0x15c   : > { %v1347_v13 = vadd.f32 %v1980_v43, %v2857_v25  ;;  %v2903_v45 = vadd.f32 %v2041_v32, %v1344_v10 }
 0x15e   : > { %v1981_v46 = vpop.f32.mrb[48].mxu0  ;;  %v2905_v48 = vadd.f32 %v2044_v44, %v1347_v13 }
 0x15f   : > { %v2045_v47 = vpop.f32.mrb[48].mxu1  ;;  %v1982_v49 = vpop.f32.mrb[49].mxu0 }
 0x160   : > { %v2046_v50 = vpop.f32.mrb[49].mxu1  ;;  %v1983_v55 = vadd.f32 %v1982_v49, %v1981_v46  ;;  %v1984_v54 = vpop.f32.mrb[50].mxu0 }
 0x161   : > { %v2047_v56 = vadd.f32 %v2046_v50, %v2045_v47  ;;  %v2048_v0 = vpop.f32.mrb[50].mxu1  ;;  %v1985_v2 = vpop.f32.mrb[51].mxu0 }
 0x162   : > { %v2049_v3 = vpop.f32.mrb[51].mxu1  ;;  %v1352_v57 = vadd.f32 %v1983_v55, %v2860_v38  ;;  %v1986_v4 = vadd.f32 %v1985_v2, %v1984_v54 }
 0x163   : > { %v2050_v5 = vadd.f32 %v2049_v3, %v2048_v0 }
 0x164   : > { %v1355_v25 = vadd.f32 %v1986_v4, %v2863_v40  ;;  %v2909_v6 = vadd.f32 %v2047_v56, %v1352_v57 }
 0x166   : > { %v1987_v7 = vpop.f32.mrb[52].mxu0  ;;  %v2911_v8 = vadd.f32 %v2050_v5, %v1355_v25 }
 0x167   : > { %v2051_v34 = vpop.f32.mrb[52].mxu1  ;;  %v1988_v9 = vpop.f32.mrb[53].mxu0 }
 0x168   : > { %v2052_v37 = vpop.f32.mrb[53].mxu1  ;;  %v1989_v14 = vadd.f32 %v1988_v9, %v1987_v7  ;;  %v1990_v18 = vpop.f32.mrb[54].mxu0 }
 0x169   : > { %v2053_v15 = vadd.f32 %v2052_v37, %v2051_v34  ;;  %v2054_v22 = vpop.f32.mrb[54].mxu1  ;;  %v1991_v29 = vpop.f32.mrb[55].mxu0 }
 0x16a   : > { %v2055_v23 = vpop.f32.mrb[55].mxu1  ;;  %v1360_v38 = vadd.f32 %v1989_v14, %v2866_v63  ;;  %v1992_v11 = vadd.f32 %v1991_v29, %v1990_v18 }
 0x16b   : > { %v2056_v17 = vadd.f32 %v2055_v23, %v2054_v22 }
 0x16c   : > { %v1363_v40 = vadd.f32 %v1992_v11, %v2869_v1  ;;  %v1457_v35 = vadd.f32 %v2053_v15, %v1360_v38 }
 0x16e   : > { %v1993_v41 = vpop.f32.mrb[56].mxu0  ;;  %v1460_v60 = vadd.f32 %v2056_v17, %v1363_v40 }
 0x16f   : > { %v2057_v53 = vpop.f32.mrb[56].mxu1  ;;  %v1994_v26 = vpop.f32.mrb[57].mxu0 }
 0x170   : > { %v2058_v58 = vpop.f32.mrb[57].mxu1  ;;  %v1995_v59 = vadd.f32 %v1994_v26, %v1993_v41  ;;  %v1996_v52 = vpop.f32.mrb[58].mxu0 }
 0x171   : > { %v2059_v61 = vadd.f32 %v2058_v58, %v2057_v53  ;;  %v2060_v30 = vpop.f32.mrb[58].mxu1  ;;  %v1997_v21 = vpop.f32.mrb[59].mxu0 }
 0x172   : > { %v2061_v32 = vpop.f32.mrb[59].mxu1  ;;  %v1368_v63 = vadd.f32 %v1995_v59, %v2872_v20  ;;  %v1998_v33 = vadd.f32 %v1997_v21, %v1996_v52 }
 0x173   : > { %v2062_v36 = vadd.f32 %v2061_v32, %v2060_v30 }
 0x174   : > { %v1371_v1 = vadd.f32 %v1998_v33, %v2875_v24  ;;  %v1465_v39 = vadd.f32 %v2059_v61, %v1368_v63 }
 0x176   : > { %v1999_v42 = vpop.f32.mrb[60].mxu0  ;;  %v1468_v43 = vadd.f32 %v2062_v36, %v1371_v1 }
 0x177   : > { %v2063_v10 = vpop.f32.mrb[60].mxu1  ;;  %v2000_v44 = vpop.f32.mrb[61].mxu0 }
 0x178   : > { %v2064_v13 = vpop.f32.mrb[61].mxu1  ;;  %v2001_v46 = vadd.f32 %v2000_v44, %v1999_v42  ;;  %v2002_v49 = vpop.f32.mrb[62].mxu0 }
 0x179   : > { %v2065_v47 = vadd.f32 %v2064_v13, %v2063_v10  ;;  %v2066_v50 = vpop.f32.mrb[62].mxu1  ;;  %v2003_v55 = vpop.f32.mrb[63].mxu0 }
 0x17a   : > { %v2067_v56 = vpop.f32.mrb[63].mxu1  ;;  %v1376_v20 = vadd.f32 %v2001_v46, %v2878_v28  ;;  %v2004_v54 = vadd.f32 %v2003_v55, %v2002_v49 }
 0x17b   : > { %v2068_v0 = vadd.f32 %v2067_v56, %v2066_v50 }
 0x17c   : > { %v1379_v24 = vadd.f32 %v2004_v54, %v2881_v31  ;;  %v1473_v2 = vadd.f32 %v2065_v47, %v1376_v20 }
 0x17e   : > { %v2103_v3 = vpop.f32.mrb[64].mxu0  ;;  %v1476_v4 = vadd.f32 %v2068_v0, %v1379_v24 }
 0x17f   : > { %v2111_v57 = vpop.f32.mrb[64].mxu1  ;;  %v1522_v28 = vadd.f32 %v2103_v3, %v2891_v12  ;;  %v1513_v25 = vpop.f32.mrb[65].mxu0 }
 0x180   : > { %v1554_v5 = vadd.f32 %v2111_v57, %v1457_v35  ;;  %v1545_v7 = vpop.f32.mrb[65].mxu1  ;;  %v1514_v31 = vadd.f32 %v1513_v25, %v2885_v51  ;;  %v2104_v9 = vpop.f32.mrb[66].mxu0 }
 0x181   : > { %v1546_v34 = vadd.f32 %v1545_v7, %v2909_v6  ;;  %v2112_v37 = vpop.f32.mrb[66].mxu1  ;;  %1578 = vst [vmem:[%s2924_s11 + $0x10] sm:$0xff] %v1522_v28  ;;  %v1525_v14 = vadd.f32 %v2104_v9, %v2893_v16  ;;  %v1516_v18 = vpop.f32.mrb[67].mxu0 }
 0x182   : > { %1586 = vst [vmem:[%s2924_s11 + $0x50] sm:$0xff] %v1554_v5  ;;  %v1557_v15 = vadd.f32 %v2112_v37, %v1460_v60  ;;  %v1548_v12 = vpop.f32.mrb[67].mxu1  ;;  %1576 = vst [vmem:[%s2924_s11] sm:$0xff] %v1514_v31  ;;  %v1517_v22 = vadd.f32 %v1516_v18, %v2887_v62 }
 0x183   : > { %1584 = vst [vmem:[%s2924_s11 + $0x40] sm:$0xff] %v1546_v34  ;;  %v1549_v51 = vadd.f32 %v1548_v12, %v2911_v8  ;;  %1579 = vst [vmem:[%s2924_s11 + $0x18] sm:$0xff] %v1525_v14 }
 0x184   : > { %1587 = vst [vmem:[%s2924_s11 + $0x58] sm:$0xff] %v1557_v15  ;;  %1577 = vst [vmem:[%s2924_s11 + $0x8] sm:$0xff] %v1517_v22 }
 0x185   : > { %1585 = vst [vmem:[%s2924_s11 + $0x48] sm:$0xff] %v1549_v51 }
 0x186   : > { %v2107_v6 = vpop.f32.mrb[68].mxu0 }
 0x187   : > { %v2115_v29 = vpop.f32.mrb[68].mxu1  ;;  %v1538_v16 = vadd.f32 %v2107_v6, %v2903_v45  ;;  %v1529_v38 = vpop.f32.mrb[69].mxu0 }
 0x188   : > { %v1570_v23 = vadd.f32 %v2115_v29, %v1473_v2  ;;  %v1561_v11 = vpop.f32.mrb[69].mxu1  ;;  %v1530_v62 = vadd.f32 %v1529_v38, %v2897_v19  ;;  %v2108_v17 = vpop.f32.mrb[70].mxu0 }
 0x189   : > { %v1562_v8 = vadd.f32 %v1561_v11, %v1465_v39  ;;  %v2116_v40 = vpop.f32.mrb[70].mxu1  ;;  %1582 = vst [vmem:[%s2924_s11 + $0x30] sm:$0xff] %v1538_v16  ;;  %v1541_v35 = vadd.f32 %v2108_v17, %v2905_v48  ;;  %v1532_v53 = vpop.f32.mrb[71].mxu0 }
 0x18a   : > { %1590 = vst [vmem:[%s2924_s11 + $0x70] sm:$0xff] %v1570_v23  ;;  %v1573_v41 = vadd.f32 %v2116_v40, %v1476_v4  ;;  %v1564_v60 = vpop.f32.mrb[71].mxu1  ;;  %1580 = vst [vmem:[%s2924_s11 + $0x20] sm:$0xff] %v1530_v62  ;;  %v1533_v45 = vadd.f32 %v1532_v53, %v2899_v27 }
 0x18b   : > { %1588 = vst [vmem:[%s2924_s11 + $0x60] sm:$0xff] %v1562_v8  ;;  %v1565_v26 = vadd.f32 %v1564_v60, %v1468_v43  ;;  %1583 = vst [vmem:[%s2924_s11 + $0x38] sm:$0xff] %v1541_v35 }
 0x18c   : > { %1591 = vst [vmem:[%s2924_s11 + $0x78] sm:$0xff] %v1573_v41  ;;  %1581 = vst [vmem:[%s2924_s11 + $0x28] sm:$0xff] %v1533_v45 }
 0x18d   : > { %1589 = vst [vmem:[%s2924_s11 + $0x68] sm:$0xff] %v1565_v26 }
 0x18e PF: > { %s13_s16 = sadd.s32 1, %s2284_s16   ;;  %s2971_s12 = smov %s2276_s14 }
 0x18f   : > { %p10_p7 = scmp.ge.s32.totalorder %s13_s16, 6   ;;  %s2972_s13 = smov %s2280_s15 }
 0x190   : > { %s2973_s14 = smov %s2976_s17  ;;  %s2974_s15 = smov %s2980_s18 }
 0x191   :  { %12 = sbr.rel (!%p10_p7) target bundleno = 3 (0x3), region = 69 }

// kernel: residual_conv_unit.3
= control target key start
LH: loop header
LB: loop body
LE: loop exit
PB: predicated region body
PF: predicated region fallthrough
CT: control target
= control target key end

     0   :  { %9 = vsyncpa [#allocation3], 0  ;;  %s3300_s0 = inlined_call_operand.vmem [shape: f32[2,18,18,128], index: 0, kind: input, shape index: {}]   ;;  %s3301_s1 = inlined_call_operand.vmem [shape: bf16[1152,128], index: 1, kind: input, shape index: {}]   ;;  %s3302_s2 = inlined_call_operand.vmem [shape: f32[1,128], index: 2, kind: input, shape index: {}]   ;;  %s3303_s3 = inlined_call_operand.vmem [shape: f32[2,16,16,128], index: 3, kind: input, shape index: {}]   ;;  %s3304_s4 = inlined_call_operand.hbm [shape: f32[2,16,16,128], index: 4, kind: output, shape index: {}]  }
   0x1   :  { %11 = vsyncpa [#allocation3 + $0x1], 0  ;;  %s2520_s15 = smov 0   ;;  %s2522_s16 = smov 0  }
   0x2   :  { %s2524_s17 = smov 0   ;;  %s2526_s18 = smov 0  }
   0x3   :  { %s2528_s19 = smov 0   ;;  %s2530_s20 = smov 0  }
   0x4   :  { %s2532_s21 = smov 0   ;;  %s2534_s22 = smov 0  }
   0x5 LB: > { %s1834_s23 = sadd.s32 4294967295, %s2490_s22   ;;  %s1835_s24 = sadd.s32 4294967294, %s2490_s22   ;;  %s2490_s22 = sphi %s2534_s22, %s17_s22   ;;  %s2486_s21 = sphi %s2532_s21, %s3316_s21   ;;  %s2482_s20 = sphi %s2530_s20, %s3315_s20   ;;  %s2478_s19 = sphi %s2528_s19, %s3314_s19   ;;  %s2474_s18 = sphi %s2526_s18, %s3313_s18   ;;  %s2470_s17 = sphi %s2524_s17, %s3312_s17   ;;  %s2466_s16 = sphi %s2522_s16, %s3311_s16   ;;  %s2462_s15 = sphi %s2520_s15, %s3310_s15  }
   0x6   : > { %s32_s25 = sadd.s32 1, %s2482_s20  ;;  %s36_s26 = sadd.s32 1, %s2486_s21 }
   0x7   : > { %p34_p0 = scmp.ge.s32.totalorder %s32_s25, 2  ;;  %p165_p1 = scmp.ne.s32.totalorder %s2470_s17, %s2466_s16 }
   0x8   : > { %p166_p2 = scmp.eq.s32.totalorder %s1834_s23, 3  ;;  %p171_p5 = scmp.ne.s32.totalorder %s2466_s16, %s2462_s15 }
   0x9   : > { %s3318_s25 = smov (%p34_p0, %s32_s25), 0  ;;  %s3320_s26 = smov (!%p34_p0, %s36_s26), %s2486_s21 }
   0xa   : > { %s149_s27 = ssub.s32 %s2482_s20, %s3318_s25  ;;  %p2571_p3 = por %p166_p2, %p165_p1 }
   0xb   : > { %p38_p4 = scmp.ge.s32.totalorder %s3320_s26, 2  ;;  %p172_p6 = scmp.eq.s32.totalorder %s1835_s24, 3 }
   0xc   : > { %p1840_p7 = scmp.ge.s32.totalorder %s2490_s22, 1  ;;  %p228_p9 = scmp.lt.s32.totalorder %s2490_s22, 5 }
   0xd   : > { %s3322_s26 = smov (%p38_p4, %s3320_s26), 0  ;;  %p2580_p8 = por %p172_p6, %p171_p5 }
   0xe   : > { %3307 = sst [smem:[#allocation5_spill]] %s3322_s26  ;;  %s148_s30 = ssub.s32 %s2486_s21, %s3322_s26 }
   0xf   : > { %s155_s5 = sadd.s32 1, %s2470_s17  ;;  %s150_s6 = sor.u32 %s149_s27, %s148_s30 }
  0x10   : > { %p229_p10 = pnand %p1840_p7, %p228_p9  ;;  %p153_p11 = scmp.eq.s32.totalorder %s150_s6, 0 }
  0x11   : > { %v2324_v0 = vld [vmem:[%s3301_s1 + $0x40] sm:$0xff] (!%p229_p10)   ;;  %v2328_v4 = vld [vmem:[%s3301_s1 + $0x48] sm:$0xff] (!%p229_p10)   ;;  %v2332_v8 = vld [vmem:[%s3301_s1 + $0x50] sm:$0xff] (!%p229_p10)   ;;  %p274_p12 = scmp.lt.s32.totalorder (!%p229_p10), %s2478_s19, 1  ;;  %s1848_s11 = smul.u32 (!%p229_p10), 192, %s2474_s18  ;;  %vm389_vm0 = vcmask (!%p229_p10), 1046528  }
  0x12   : > { %s2589_s7 = scalar_select %p153_p11, %s2470_s17, %s155_s5  }
  0x13   : > { %232 = sbr.rel (%p229_p10) target bundleno = 423 (0x1a7), region = 36  ;;  %v2325_v1 = vld [vmem:[%s3301_s1 + $0xc0] sm:$0xff] (!%p229_p10)   ;;  %1930 = vmatprep.subr.bf16.mxu0 (!%p229_p10), %v2324_v0  ;;  %v2329_v5 = vld [vmem:[%s3301_s1 + $0xc8] sm:$0xff] (!%p229_p10)   ;;  %v2333_v9 = vld [vmem:[%s3301_s1 + $0xd0] sm:$0xff] (!%p229_p10)   ;;  %vm446_vm1 = vcmask (!%p229_p10), 1045504   ;;  %s1843_s26 = sshll.u32 (!%p229_p10), %s2474_s18, 3 }
  0x14   : > { %v2326_v2 = vld [vmem:[%s3301_s1] sm:$0xff] (!%p229_p10)   ;;  %1994 = vmatprep.subr.bf16.mxu1 (!%p229_p10), %v2325_v1  ;;  %v2330_v6 = vld [vmem:[%s3301_s1 + $0x8] sm:$0xff] (!%p229_p10)   ;;  %v2334_v10 = vld [vmem:[%s3301_s1 + $0x10] sm:$0xff] (!%p229_p10)   ;;  %p289_p13 = scmp.lt.s32.totalorder (!%p229_p10), %s1843_s26, 15  ;;  %s1929_s8 = sshll.u32 (!%p229_p10), %s2474_s18, 4 }
  0x15   : > { %v2327_v3 = vld [vmem:[%s3301_s1 + $0x80] sm:$0xff] (!%p229_p10)   ;;  %1931 = vmatpush3.bf16.msra.mxu0 (!%p229_p10), %v2326_v2  ;;  %v2331_v7 = vld [vmem:[%s3301_s1 + $0x88] sm:$0xff] (!%p229_p10)   ;;  %v2335_v11 = vld [vmem:[%s3301_s1 + $0x90] sm:$0xff] (!%p229_p10)   ;;  %s2492_s23 = smov (!%p229_p10), [#allocation2]  }
  0x16   : > { %1995 = vmatpush3.bf16.msra.mxu1 (!%p229_p10), %v2327_v3  ;;  %1932 = vmatprep.subr.bf16.mxu0 (!%p229_p10), %v2328_v4  ;;  %v2336_v12 = vld [vmem:[%s3301_s1 + $0x58] sm:$0xff] (!%p229_p10)   ;;  %v2340_v16 = vld [vmem:[%s3301_s1 + $0x60] sm:$0xff] (!%p229_p10)   ;;  %v2344_v20 = vld [vmem:[%s3301_s1 + $0x68] sm:$0xff] (!%p229_p10)  }
  0x17   : > { %1996 = vmatprep.subr.bf16.mxu1 (!%p229_p10), %v2329_v5  ;;  %v2337_v13 = vld [vmem:[%s3301_s1 + $0xd8] sm:$0xff] (!%p229_p10)   ;;  %v2341_v17 = vld [vmem:[%s3301_s1 + $0xe0] sm:$0xff] (!%p229_p10)   ;;  %v2345_v21 = vld [vmem:[%s3301_s1 + $0xe8] sm:$0xff] (!%p229_p10)  }
  0x18   : > { %v2338_v14 = vld [vmem:[%s3301_s1 + $0x18] sm:$0xff] (!%p229_p10)   ;;  %v2342_v18 = vld [vmem:[%s3301_s1 + $0x20] sm:$0xff] (!%p229_p10)   ;;  %v2346_v22 = vld [vmem:[%s3301_s1 + $0x28] sm:$0xff] (!%p229_p10)  }
  0x19   : > { %1933 = vmatpush3.bf16.msra.mxu0 (!%p229_p10), %v2330_v6  ;;  %v2339_v15 = vld [vmem:[%s3301_s1 + $0x98] sm:$0xff] (!%p229_p10)   ;;  %v2343_v19 = vld [vmem:[%s3301_s1 + $0xa0] sm:$0xff] (!%p229_p10)   ;;  %v2347_v23 = vld [vmem:[%s3301_s1 + $0xa8] sm:$0xff] (!%p229_p10)  }
  0x1a   : > { %1997 = vmatpush3.bf16.msra.mxu1 %v2331_v7  ;;  %1934 = vmatprep.subr.bf16.mxu0 %v2332_v8  ;;  %s2650_s6 = scalar_select %p274_p12, %s2478_s19, 1  ;;  %v2348_v24 = vld [vmem:[%s3301_s1 + $0x70] sm:$0xff]   ;;  %v2352_v28 = vld [vmem:[%s3301_s1 + $0x78] sm:$0xff]   ;;  %v2356_v40 = vld [vmem:[%s3301_s1 + $0x140] sm:$0xff]  }
  0x1b   : > { %1998 = vmatprep.subr.bf16.mxu1 %v2333_v9  ;;  %v2349_v25 = vld [vmem:[%s3301_s1 + $0xf0] sm:$0xff]   ;;  %v2353_v29 = vld [vmem:[%s3301_s1 + $0xf8] sm:$0xff]   ;;  %v2357_v46 = vld [vmem:[%s3301_s1 + $0x1c0] sm:$0xff]   ;;  %s3324_s26 = smov (!%p289_p13, %s1843_s26), 15 }
  0x1c   : > { %s2250_s24 = smul.u32 432, %s2650_s6  ;;  %v2350_v26 = vld [vmem:[%s3301_s1 + $0x30] sm:$0xff]   ;;  %v2354_v30 = vld [vmem:[%s3301_s1 + $0x38] sm:$0xff]   ;;  %v2358_v51 = vld [vmem:[%s3301_s1 + $0x100] sm:$0xff]   ;;  %s1845_s13 = sshll.u32 %s2650_s6, 5 }
  0x1d   : > { %1935 = vmatpush3.bf16.msra.mxu0 %v2334_v10  ;;  %v2351_v27 = vld [vmem:[%s3301_s1 + $0xb0] sm:$0xff]   ;;  %v2355_v31 = vld [vmem:[%s3301_s1 + $0xb8] sm:$0xff]   ;;  %v2359_v58 = vld [vmem:[%s3301_s1 + $0x180] sm:$0xff]   ;;  %s271_s6 = sand.u32 1, %s2466_s16  }
  0x1e   : > { %1999 = vmatpush3.bf16.msra.mxu1 %v2335_v11  ;;  %1936 = vmatprep.subr.bf16.mxu0 %v2336_v12  ;;  %s278_s27 = scalar_lea.vmem %s3300_s0, %s2250_s24  ;;  %v2360_v3 = vld [vmem:[%s3301_s1 + $0x148] sm:$0xff]   ;;  %s1844_s24 = sshll.u32 %s3324_s26, 1 }
  0x1f   : > { %2000 = vmatprep.subr.bf16.mxu1 %v2337_v13  ;;  %s2690_s12 = scalar_lea.vmem %s278_s27, %s1848_s11  ;;  %v2361_v7 = vld [vmem:[%s3301_s1 + $0x1c8] sm:$0xff]   ;;  %s296_s14 = sadd.s32 %s1845_s13, %s1844_s24 }
  0x20   : > { %v305_v32 = vld [vmem:[%s2690_s12] sm:$0xff]  ;;  %v306_v33 = vld [vmem:[%s2690_s12 + $0x8] sm:$0xff]  ;;  %v307_v34 = vld [vmem:[%s2690_s12 + $0x10] sm:$0x3]  ;;  %s1846_s11 = sshll.u32 %s296_s14, 3  ;;  %s3184_s5 = sshll.u32 %s271_s6, 7 }
  0x21   : > { %1937 = vmatpush3.bf16.msra.mxu0 %v2338_v14  ;;  %v335_v35 = vmax.f32 %v305_v32, 0.0  ;;  %v336_v36 = vmax.f32 %v306_v33, 0.0  ;;  %v337_v37 = vmax.f32 %v307_v34, 0.0  ;;  %v308_v38 = vld [vmem:[%s2690_s12 + $0x18] sm:$0xff]  ;;  %v309_v39 = vld [vmem:[%s2690_s12 + $0x20] sm:$0xff]  ;;  %v311_v0 = vld [vmem:[%s2690_s12 + $0x30] sm:$0xff]  ;;  %s3179_s30 = scalar_lea.vmem %s3303_s3, %s1846_s11 }
  0x22   : > { %2001 = vmatpush3.bf16.msra.mxu1 %v2339_v15  ;;  %1938 = vmatprep.subr.bf16.mxu0 %v2340_v16  ;;  %v338_v41 = vmax.f32 %v308_v38, 0.0  ;;  %v339_v42 = vmax.f32 %v309_v39, 0.0  ;;  %v310_v59 = vld [vmem:[%s2690_s12 + $0x28] sm:$0x3]  ;;  %v312_v1 = vld [vmem:[%s2690_s12 + $0x38] sm:$0xff]  ;;  %v341_v4 = vmax.f32 %v311_v0, 0.0 }
  0x23   : > { %2002 = vmatprep.subr.bf16.mxu1 %v2341_v17  ;;  %v390_v43 = vrot.slane %v335_v35, 1  ;;  %v391_v44 = vrot.slane %v336_v36, 1  ;;  %v393_v45 = vrot.slane %v337_v37, 1  ;;  %v447_v48 = vrot.slane %v335_v35, 2  ;;  %v2362_v15 = vld [vmem:[%s3301_s1 + $0x108] sm:$0xff]   ;;  %v2365_v33 = vld [vmem:[%s3301_s1 + $0x1d0] sm:$0xff]  }
  0x24   : > { %v2709_v47 = vpack.c.bf16 %v339_v42, %v338_v41  ;;  %v448_v49 = vrot.slane %v336_v36, 2  ;;  %v450_v50 = vrot.slane %v337_v37, 2  ;;  %v537_v54 = vpack.c.bf16 %v336_v36, %v335_v35  ;;  %v2366_v34 = vld [vmem:[%s3301_s1 + $0x110] sm:$0xff]   ;;  %v316_v39 = vld [vmem:[%s2690_s12 + $0x58] sm:$0x3]  ;;  %s3203_s9 = scalar_lea.vmem [#allocation2], %s3184_s5 }
  0x25   : > { %1939 = vmatpush3.bf16.msra.mxu0 %v2342_v18  ;;  %v392_v52 = vsel %vm389_vm0, %v390_v43, %v391_v44  ;;  %v394_v53 = vsel %vm389_vm0, %v391_v44, %v393_v45  ;;  %v395_v60 = vrot.slane %v338_v41, 1  ;;  %v340_v62 = vmax.f32 %v310_v59, 0.0  ;;  %v2363_v18 = vld [vmem:[%s3301_s1 + $0x188] sm:$0xff]   ;;  %v2367_v38 = vld [vmem:[%s3301_s1 + $0x190] sm:$0xff]   ;;  %v317_v45 = vld [vmem:[%s2690_s12 + $0x60] sm:$0xff]  ;;  %s1701_s10 = sshll.u32 %s3203_s9, 4  ;;  %s3238_s10 = int_to_ptr.vmem [resolvable:$true] %s1701_s10 }
  0x26   : > { %2003 = vmatpush3.bf16.msra.mxu1 %v2343_v19  ;;  %1940 = vmatprep.subr.bf16.mxu0 %v2344_v20  ;;  %v538_v55 = vpack.c.bf16 %v394_v53, %v392_v52  ;;  %v449_v56 = vsel %vm446_vm1, %v447_v48, %v448_v49  ;;  %v451_v57 = vsel %vm446_vm1, %v448_v49, %v450_v50  ;;  %v396_v63 = vrot.slane %v339_v42, 1  ;;  %v313_v19 = vld [vmem:[%s2690_s12 + $0x40] sm:$0x3]  ;;  %v2368_v53 = vld [vmem:[%s3301_s1 + $0x158] sm:$0xff]   ;;  %s3248_s14 = scalar_lea.sflag [#allocation3], %s271_s6  ;;  %s2396_s11 = scalar_lea.vmem %s3238_s10, 2048 }
  0x27   : > { %2004 = vmatprep.subr.bf16.mxu1 %v2345_v21  ;;  %1279 = vmatprep.mubr.bf16.mxu1 %v2709_v47  ;;  %v539_v61 = vpack.c.bf16 %v451_v57, %v449_v56  ;;  %v452_v2 = vrot.slane %v338_v41, 2  ;;  %v342_v5 = vmax.f32 %v312_v1, 0.0  ;;  %v453_v6 = vrot.slane %v339_v42, 2  ;;  %v314_v21 = vld [vmem:[%s2690_s12 + $0x48] sm:$0xff]  ;;  %v2370_v59 = vld [vmem:[%s3301_s1 + $0x118] sm:$0xff]   ;;  %p2397_p0 = scmp.ne.s32.totalorder %s3238_s10, %s2396_s11  ;;  %s2400_s27 = sshll.u32 %s2492_s23, 4  ;;  %s2401_s27 = int_to_ptr.vmem [resolvable:$false] %s2400_s27 }
  0x28   : > { %1182 = vmatprep.mubr.bf16.mxu0 %v538_v55  ;;  %v397_v8 = vsel %vm389_vm0, %v395_v60, %v396_v63  ;;  %v398_v9 = vrot.slane %v340_v62, 1  ;;  %v455_v10 = vrot.slane %v340_v62, 2  ;;  %v400_v16 = vrot.slane %v341_v4, 1  ;;  %v319_v62 = vld [vmem:[%s2690_s12 + $0x70] sm:$0x3]  ;;  %v320_v1 = vld [vmem:[%s2690_s12 + $0x78] sm:$0xff]  ;;  %p2403_p4 = scmp.lt.s32.totalorder %s3238_s10, %s2401_s27 }
  0x29   : > { %1941 = vmatpush3.bf16.msra.mxu0 %v2346_v22  ;;  %v2732_v11 = vpack.c.bf16 %v342_v5, %v341_v4  ;;  %v454_v12 = vsel %vm446_vm1, %v452_v2, %v453_v6  ;;  %v401_v20 = vrot.slane %v342_v5, 1  ;;  %v457_v22 = vrot.slane %v341_v4, 2  ;;  %p2398_p1 = pnand %p2397_p0, %p2571_p3 }
  0x2a   : > { %2005 = vmatpush3.bf16.msra.mxu1 %v2347_v23  ;;  %1942 = vmatprep.subr.bf16.mxu0 %v2348_v24  ;;  %v399_v13 = vsel %vm389_vm0, %v396_v63, %v398_v9  ;;  %v456_v14 = vsel %vm446_vm1, %v453_v6, %v455_v10  ;;  %v343_v24 = vmax.f32 %v313_v19, 0.0  ;;  %v346_v43 = vmax.f32 %v316_v39, 0.0  ;;  %v2373_v10 = vld [vmem:[%s3301_s1 + $0x1e0] sm:$0xff]  }
  0x2b   : > { %2006 = vmatprep.subr.bf16.mxu1 %v2349_v25  ;;  %v2740_v17 = vpack.c.bf16 %v399_v13, %v397_v8  ;;  %v2748_v23 = vpack.c.bf16 %v456_v14, %v454_v12  ;;  %v315_v25 = vld [vmem:[%s2690_s12 + $0x50] sm:$0xff]  ;;  %v349_v2 = vmax.f32 %v319_v62, 0.0  ;;  %v2817_v4 = vmax.f32 %v320_v1, 0.0  ;;  %v2374_v12 = vld [vmem:[%s3301_s1 + $0x120] sm:$0xff]   ;;  %p2399_p2 = pneg %p2398_p1 }
  0x2c   : > { %v460_v32 = vrot.slane %v343_v24, 2 }
  0x2d   : > { %1943 = vmatpush3.bf16.msra.mxu0 %v2350_v26  ;;  %v2751_v26 = vmax.f32 %v314_v21, 0.0  ;;  %v413_v8 = vrot.slane %v349_v2, 1  ;;  %v470_v21 = vrot.slane %v349_v2, 2  ;;  %v472_v39 = vrot.slane %v2817_v4, 2 }
  0x2e   : > { %2007 = vmatpush3.bf16.msra.mxu1 %v2351_v27  ;;  %1944 = vmatprep.subr.bf16.mxu0 %v2352_v28  ;;  %v458_v27 = vrot.slane %v342_v5, 2  ;;  %v345_v28 = vmax.f32 %v315_v25, 0.0  ;;  %v2372_v5 = vld [vmem:[%s3301_s1 + $0x160] sm:$0xff]  }
  0x2f   : > { %2008 = vmatprep.subr.bf16.mxu1 %v2353_v29  ;;  %v2364_v29 = vld [vmem:[%s3301_s1 + $0x150] sm:$0xff]   ;;  %v462_v49 = vrot.slane %v2751_v26, 2 }
  0x30   : > { %v2765_v35 = vpack.c.bf16 %v345_v28, %v2751_v26  ;;  %v459_v37 = vsel %vm446_vm1, %v457_v22, %v458_v27  ;;  %v461_v42 = vsel %vm446_vm1, %v458_v27, %v460_v32  ;;  %v406_v44 = vrot.slane %v345_v28, 1  ;;  %v2376_v32 = vld [vmem:[%s3301_s1 + $0x168] sm:$0xff]  }
  0x31   : > { %1945 = vmatpush3.bf16.msra.mxu0 %v2354_v30  ;;  %v402_v30 = vsel %vm389_vm0, %v400_v16, %v401_v20  ;;  %v463_v52 = vrot.slane %v345_v28, 2  ;;  %v2795_v55 = vpack.c.bf16 %v461_v42, %v459_v37  ;;  %v2375_v16 = vld [vmem:[%s3301_s1 + $0x1a0] sm:$0xff]   ;;  %v415_v27 = vrot.slane %v2817_v4, 1  ;;  %v2379_v42 = vld [vmem:[%s3301_s1 + $0x1a8] sm:$0xff]  }
  0x32   : > { %2009 = vmatpush3.bf16.msra.mxu1 %v2355_v31  ;;  %2058 = vmatprep.subr.bf16.mxu0 %v2356_v40  ;;  %v403_v31 = vrot.slane %v343_v24, 1  ;;  %v405_v40 = vrot.slane %v2751_v26, 1  ;;  %v323_v24 = vld [vmem:[%s2690_s12 + $0x90] sm:$0xff] }
  0x33   : > { %2122 = vmatprep.subr.bf16.mxu1 %v2357_v46  ;;  %v318_v46 = vld [vmem:[%s2690_s12 + $0x68] sm:$0xff]  ;;  %v464_v6 = vsel %vm446_vm1, %v462_v49, %v463_v52  ;;  %v327_v49 = vld [vmem:[%s2690_s12 + $0xb0] sm:$0xff] }
  0x34   : > { %1183 = vmatmul.mubr.bf16.vlgmr.msra.gmra.mrb[0].mxu0 %v537_v54  ;;  %v404_v36 = vsel %vm389_vm0, %v401_v20, %v403_v31  ;;  %v2784_v48 = vmax.f32 %v318_v46, 0.0  ;;  %v407_v50 = vsel %vm389_vm0, %v405_v40, %v406_v44  ;;  %v2369_v54 = vld [vmem:[%s3301_s1 + $0x1d8] sm:$0xff]   ;;  %v2854_v31 = vmax.f32 %v323_v24, 0.0 }
  0x35   : > { %1280 = vmatmul.mubr.bf16.vlgmr.msra.gmra.mrb[0].mxu1 %v539_v61  ;;  %2059 = vmatpush3.bf16.msra.mxu0 %v2358_v51  ;;  %v2776_v41 = vpack.c.bf16 %v404_v36, %v402_v30  ;;  %v408_v51 = vrot.slane %v346_v43, 1  ;;  %v2371_v61 = vld [vmem:[%s3301_s1 + $0x198] sm:$0xff]   ;;  %v2378_v36 = vld [vmem:[%s3301_s1 + $0x128] sm:$0xff]   ;;  %v2908_v1 = vmax.f32 %v327_v49, 0.0 }
  0x36   : > { %2123 = vmatpush3.bf16.msra.mxu1 %v2359_v58  ;;  %2060 = vmatprep.subr.bf16.mxu0 %v2360_v3  ;;  %v465_v58 = vrot.slane %v346_v43, 2  ;;  %v411_v0 = vrot.slane %v2784_v48, 1  ;;  %v321_v3 = vld [vmem:[%s2690_s12 + $0x80] sm:$0xff]  ;;  %v468_v20 = vrot.slane %v2784_v48, 2  ;;  %v477_v2 = vrot.slane %v2854_v31, 2  ;;  %v2387_v24 = vld [vmem:[%s3301_s1 + $0x1b8] sm:$0xff]  }
  0x37   : > { %2124 = vmatprep.subr.bf16.mxu1 %v2361_v7  ;;  %1287 = vmatprep.mubr.bf16.mxu1 %v2732_v11  ;;  %v409_v56 = vsel %vm389_vm0, %v406_v44, %v408_v51  ;;  %v2826_v9 = vmax.f32 %v321_v3, 0.0  ;;  %v325_v43 = vld [vmem:[%s2690_s12 + $0xa0] sm:$0x3]  ;;  %v326_v44 = vld [vmem:[%s2690_s12 + $0xa8] sm:$0xff]  ;;  %v2380_v51 = vld [vmem:[%s3301_s1 + $0x170] sm:$0xff]  }
  0x38   : > { %1190 = vmatprep.mubr.bf16.mxu0 %v2740_v17  ;;  %v2805_v60 = vpack.c.bf16 %v409_v56, %v407_v50  ;;  %v466_v7 = vsel %vm446_vm1, %v463_v52, %v465_v58  ;;  %v414_v14 = vsel %vm389_vm0, %v411_v0, %v413_v8  ;;  %v420_v50 = vrot.slane %v2854_v31, 1  ;;  %v2381_v56 = vld [vmem:[%s3301_s1 + $0x1f0] sm:$0xff]  }
  0x39   : > { %2061 = vmatpush3.bf16.msra.mxu0 %v2362_v15  ;;  %v2841_v19 = vpack.c.bf16 %v466_v7, %v464_v6  ;;  %v2849_v26 = vpack.c.bf16 %v2826_v9, %v2817_v4  ;;  %v416_v28 = vrot.slane %v2826_v9, 1  ;;  %v473_v40 = vrot.slane %v2826_v9, 2  ;;  %v2382_v58 = vld [vmem:[%s3301_s1 + $0x130] sm:$0xff]   ;;  %v329_v6 = vld [vmem:[%s2690_s12 + $0xc0] sm:$0xff]  ;;  %v330_v7 = vld [vmem:[%s2690_s12 + $0xc8] sm:$0xff] }
  0x3a   : > { %2125 = vmatpush3.bf16.msra.mxu1 %v2363_v18  ;;  %2062 = vmatprep.subr.bf16.mxu0 %v2364_v29  ;;  %v322_v18 = vld [vmem:[%s2690_s12 + $0x88] sm:$0x3]  ;;  %v324_v29 = vld [vmem:[%s2690_s12 + $0x98] sm:$0xff] }
  0x3b   : > { %2126 = vmatprep.subr.bf16.mxu1 %v2365_v33  ;;  %v352_v22 = vmax.f32 %v322_v18, 0.0  ;;  %v2377_v33 = vld [vmem:[%s3301_s1 + $0x1e8] sm:$0xff]   ;;  %v474_v8 = vsel %vm446_vm1, %v472_v39, %v473_v40  ;;  %v359_v18 = vmax.f32 %v329_v6, 0.0 }
  0x3c   : > { %1191 = vmatmul.mubr.bf16.gmra.mrb[4].mxu0 %v2709_v47  ;;  %v2782_v47 = vmax.f32 %v317_v45, 0.0  ;;  %v417_v45 = vsel %vm389_vm0, %v415_v27, %v416_v28 }
  0x3d   : > { %1288 = vmatmul.mubr.bf16.gmra.mrb[4].mxu1 %v2748_v23  ;;  %2063 = vmatpush3.bf16.msra.mxu0 %v2366_v34  ;;  %v418_v30 = vrot.slane %v352_v22, 1  ;;  %v2864_v34 = vmax.f32 %v324_v29, 0.0 }
  0x3e   : > { %1295 = vmatprep.mubr.bf16.mxu1 %v2765_v35  ;;  %2127 = vmatpush3.bf16.msra.mxu1 %v2367_v38  ;;  %v2800_v57 = vpack.c.bf16 %v2784_v48, %v2782_v47  ;;  %v410_v63 = vrot.slane %v2782_v47, 1  ;;  %v467_v15 = vrot.slane %v2782_v47, 2  ;;  %v471_v38 = vsel %vm446_vm1, %v468_v20, %v470_v21 }
  0x3f   : > { %1198 = vmatprep.mubr.bf16.mxu0 %v2776_v41  ;;  %2064 = vmatprep.subr.bf16.mxu0 %v2368_v53  ;;  %v419_v46 = vsel %vm389_vm0, %v416_v28, %v418_v30  ;;  %v475_v47 = vrot.slane %v352_v22, 2  ;;  %v355_v48 = vmax.f32 %v325_v43, 0.0  ;;  %v421_v53 = vrot.slane %v2864_v34, 1  ;;  %v2947_v30 = vld [vmem:[%s3301_s1 + $0x200] sm:$0xff]   ;;  %v331_v43 = vld [vmem:[%s2690_s12 + $0xd0] sm:$0x3] }
  0x40   : > { %2128 = vmatprep.subr.bf16.mxu1 %v2369_v54  ;;  %v412_v13 = vsel %vm389_vm0, %v410_v63, %v411_v0  ;;  %v469_v37 = vsel %vm446_vm1, %v467_v15, %v468_v20  ;;  %v2890_v54 = vmax.f32 %v326_v44, 0.0  ;;  %v2383_v63 = vld [vmem:[%s3301_s1 + $0x1b0] sm:$0xff]   ;;  %v328_v0 = vld [vmem:[%s2690_s12 + $0xb8] sm:$0x3]  ;;  %v478_v3 = vrot.slane %v2864_v34, 2 }
  0x41   : > { %2065 = vmatpush3.bf16.msra.mxu0 %v2370_v59  ;;  %v2845_v25 = vpack.c.bf16 %v414_v14, %v412_v13  ;;  %v2887_v52 = vpack.c.bf16 %v471_v38, %v469_v37  ;;  %v2898_v59 = vpack.c.bf16 %v419_v46, %v417_v45  ;;  %v423_v62 = vrot.slane %v355_v48, 1  ;;  %v2384_v13 = vld [vmem:[%s3301_s1 + $0x178] sm:$0xff]  }
  0x42   : > { %2129 = vmatpush3.bf16.msra.mxu1 %v2371_v61  ;;  %2066 = vmatprep.subr.bf16.mxu0 %v2372_v5  ;;  %v2902_v61 = vpack.c.bf16 %v2864_v34, %v2854_v31  ;;  %v480_v4 = vrot.slane %v355_v48, 2  ;;  %v425_v5 = vrot.slane %v2890_v54, 1  ;;  %v476_v9 = vsel %vm446_vm1, %v473_v40, %v475_v47  ;;  %v2385_v14 = vld [vmem:[%s3301_s1 + $0x1f8] sm:$0xff]  }
  0x43   : > { %2130 = vmatprep.subr.bf16.mxu1 %v2373_v10  ;;  %v358_v10 = vmax.f32 %v328_v0, 0.0  ;;  %v422_v15 = vsel %vm389_vm0, %v420_v50, %v421_v53  ;;  %v2386_v20 = vld [vmem:[%s3301_s1 + $0x138] sm:$0xff]   ;;  %v2933_v21 = vpack.c.bf16 %v476_v9, %v474_v8  ;;  %v360_v22 = vmax.f32 %v330_v7, 0.0 }
  0x44   : > { %1199 = vmatmul.mubr.bf16.gmra.mrb[8].mxu0 %v2732_v11  ;;  %v2942_v28 = vpack.c.bf16 %v2908_v1, %v2890_v54  ;;  %v479_v31 = vsel %vm446_vm1, %v477_v2, %v478_v3  ;;  %v483_v45 = vrot.slane %v2908_v1, 2  ;;  %v361_v47 = vmax.f32 %v331_v43, 0.0  ;;  %v332_v48 = vld [vmem:[%s2690_s12 + $0xd8] sm:$0xff] }
  0x45   : > { %1296 = vmatmul.mubr.bf16.gmra.mrb[8].mxu1 %v2795_v55  ;;  %1206 = vmatprep.mubr.bf16.mxu0 %v2805_v60  ;;  %v428_v29 = vrot.slane %v358_v10, 1  ;;  %v507_v34 = vrot.slane %v360_v22, 1  ;;  %v514_v37 = vrot.slane %v360_v22, 2  ;;  %v2963_v44 = vpack.c.bf16 %v360_v22, %v359_v18 }
  0x46   : > { %1303 = vmatprep.mubr.bf16.mxu1 %v2800_v57  ;;  %2067 = vmatpush3.bf16.msra.mxu0 %v2374_v12  ;;  %v426_v12 = vrot.slane %v2908_v1, 1  ;;  %v485_v46 = vrot.slane %v358_v10, 2 }
  0x47   : > { %2131 = vmatpush3.bf16.msra.mxu1 %v2375_v16  ;;  %2068 = vmatprep.subr.bf16.mxu0 %v2376_v32  ;;  %v424_v16 = vsel %vm389_vm0, %v421_v53, %v423_v62  ;;  %v481_v32 = vsel %vm446_vm1, %v478_v3, %v480_v4  ;;  %v333_v53 = vld [vmem:[%s2690_s12 + $0xe0] sm:$0xff]  ;;  %v509_v62 = vrot.slane %v361_v47, 1 }
  0x48   : > { %2132 = vmatprep.subr.bf16.mxu1 %v2377_v33  ;;  %v2938_v27 = vpack.c.bf16 %v424_v16, %v422_v15  ;;  %v506_v33 = vrot.slane %v359_v18, 1  ;;  %v427_v38 = vsel %vm389_vm0, %v425_v5, %v426_v12  ;;  %v429_v39 = vsel %vm389_vm0, %v426_v12, %v428_v29  ;;  %v2389_v29 = vld [vmem:[%s3301_s1 + $0x208] sm:$0xff]  }
  0x49   : > { %v2959_v40 = vpack.c.bf16 %v481_v32, %v479_v31  ;;  %v2967_v49 = vpack.c.bf16 %v429_v39, %v427_v38  ;;  %v510_v3 = vsel %vm389_vm0, %v507_v34, %v509_v62  ;;  %v486_v12 = vsel %vm446_vm1, %v483_v45, %v485_v46 }
  0x4a   : > { %2069 = vmatpush3.bf16.msra.mxu0 %v2378_v36  ;;  %v513_v36 = vrot.slane %v359_v18, 2  ;;  %v508_v50 = vsel %vm389_vm0, %v506_v33, %v507_v34 }
  0x4b   : > { %2133 = vmatpush3.bf16.msra.mxu1 %v2379_v42  ;;  %2070 = vmatprep.subr.bf16.mxu0 %v2380_v51  ;;  %v482_v42 = vrot.slane %v2890_v54, 2  ;;  %v516_v54 = vrot.slane %v361_v47, 2  ;;  %v2985_v8 = vpack.c.bf16 %v510_v3, %v508_v50 }
  0x4c   : > { %1207 = vmatmul.mubr.bf16.gmra.mrb[12].mxu0 %v2765_v35  ;;  %2134 = vmatprep.subr.bf16.mxu1 %v2381_v56  ;;  %v515_v51 = vsel %vm446_vm1, %v513_v36, %v514_v37  ;;  %v334_v56 = vld [vmem:[%s2690_s12 + $0xe8] sm:$0x3]  ;;  %s1925_s12 = sshll.u32 %s2478_s19, 5 }
  0x4d   : > { %1304 = vmatmul.mubr.bf16.gmra.mrb[12].mxu1 %v2841_v19  ;;  %1214 = vmatprep.mubr.bf16.mxu0 %v2845_v25  ;;  %v364_v0 = vmax.f32 %v334_v56, 0.0  ;;  %v517_v4 = vsel %vm446_vm1, %v514_v37, %v516_v54  ;;  %v484_v7 = vsel %vm446_vm1, %v482_v42, %v483_v45  ;;  %s3211_s18 = sadd.s32 %s1929_s8, %s1925_s12 }
  0x4e   : > { %1311 = vmatprep.mubr.bf16.mxu1 %v2849_v26  ;;  %2071 = vmatpush3.bf16.msra.mxu0 %v2382_v58  ;;  %v2973_v58 = vmax.f32 %v332_v48, 0.0  ;;  %v2987_v9 = vpack.c.bf16 %v517_v4, %v515_v51  ;;  %v3007_v22 = vpack.c.bf16 %v486_v12, %v484_v7  ;;  %s1926_s19 = sshll.u32 %s3211_s18, 7 }
  0x4f   : > { %2135 = vmatpush3.bf16.msra.mxu1 %v2383_v63  ;;  %2072 = vmatprep.subr.bf16.mxu0 %v2384_v13  ;;  %v2975_v63 = vmax.f32 %v333_v53, 0.0  ;;  %v526_v6 = vrot.slane %v364_v0, 1  ;;  %v533_v15 = vrot.slane %v364_v0, 2  ;;  %s3236_s13 = scalar_lea.hbm %s3304_s4, %s1926_s19 }
  0x50   : > { %2136 = vmatprep.subr.bf16.mxu1 %v2385_v14  ;;  %v523_v1 = vrot.slane %v2973_v58, 1  ;;  %v530_v2 = vrot.slane %v2973_v58, 2 }
  0x51   : > { %v524_v5 = vrot.slane %v2975_v63, 1  ;;  %v531_v10 = vrot.slane %v2975_v63, 2 }
  0x52   : > { %2073 = vmatpush3.bf16.msra.mxu0 %v2386_v20 }
  0x53   : > { %2137 = vmatpush3.bf16.msra.mxu1 %v2387_v24  ;;  %2202 = vmatprep.subr.bf16.mxu0 %v2947_v30  ;;  %v2994_v13 = vsel %vm389_vm0, %v523_v1, %v524_v5  ;;  %v2997_v14 = vsel %vm389_vm0, %v524_v5, %v526_v6  ;;  %v3002_v18 = vsel %vm446_vm1, %v530_v2, %v531_v10 }
  0x54   : > { %1215 = vmatmul.mubr.bf16.gmra.mrb[16].mxu0 %v2800_v57  ;;  %2234 = vmatprep.subr.bf16.mxu1 %v2947_v30  ;;  %v565_v16 = vpack.c.bf16 %v2997_v14, %v2994_v13  ;;  %v3005_v20 = vsel %vm446_vm1, %v531_v10, %v533_v15 }
  0x55   : > { %1312 = vmatmul.mubr.bf16.gmra.mrb[16].mxu1 %v2887_v52  ;;  %1222 = vmatprep.mubr.bf16.mxu0 %v2898_v59  ;;  %v566_v24 = vpack.c.bf16 %v3005_v20, %v3002_v18 }
  0x56   : > { %1319 = vmatprep.mubr.bf16.mxu1 %v2902_v61 }
  0x5c   : > { %1223 = vmatmul.mubr.bf16.gmra.mrb[20].mxu0 %v2849_v26 }
  0x5d   : > { %1320 = vmatmul.mubr.bf16.gmra.mrb[20].mxu1 %v2933_v21  ;;  %1230 = vmatprep.mubr.bf16.mxu0 %v2938_v27 }
  0x5e   : > { %1327 = vmatprep.mubr.bf16.mxu1 %v2942_v28 }
  0x64   : > { %1231 = vmatmul.mubr.bf16.gmra.mrb[24].mxu0 %v2902_v61 }
  0x65   : > { %1328 = vmatmul.mubr.bf16.gmra.mrb[24].mxu1 %v2959_v40  ;;  %1238 = vmatprep.mubr.bf16.mxu0 %v2967_v49 }
  0x66   : > { %1335 = vmatprep.mubr.bf16.mxu1 %v2963_v44 }
  0x6c   : > { %1239 = vmatmul.mubr.bf16.gmra.mrb[28].mxu0 %v2942_v28 }
  0x6d   : > { %1336 = vmatmul.mubr.bf16.gmra.mrb[28].mxu1 %v3007_v22  ;;  %1376 = vmatprep.mubr.bf16.mxu0 %v2748_v23  ;;  %v2390_v23 = vld [vmem:[%s3301_s1 + $0x210] sm:$0xff]  }
  0x6e   : > { %1473 = vmatprep.mubr.bf16.mxu1 %v2776_v41 }
  0x74   : > { %1377 = vmatmul.mubr.bf16.vlgmr.msra.gmra.mrb[32].mxu0 %v2740_v17  ;;  %v2392_v17 = vld [vmem:[%s3301_s1 + $0x220] sm:$0xff]  }
  0x75   : > { %1474 = vmatmul.mubr.bf16.vlgmr.msra.gmra.mrb[32].mxu1 %v2732_v11  ;;  %2203 = vmatpush3.bf16.msra.mxu0 %v2947_v30  ;;  %v2391_v11 = vld [vmem:[%s3301_s1 + $0x218] sm:$0xff]  }
  0x76   : > { %2242 = vmatpush3.bf16.msra.mxu1 %v2947_v30  ;;  %1384 = vmatprep.mubr.bf16.mxu0 %v2795_v55 }
  0x77   : > { %1481 = vmatprep.mubr.bf16.mxu1 %v2805_v60  ;;  %2204 = vmatprep.subr.bf16.mxu0 %v2389_v29 }
  0x78   : > { %2235 = vmatprep.subr.bf16.mxu1 %v2389_v29 }
  0x79   : > { %2205 = vmatpush3.bf16.msra.mxu0 %v2389_v29 }
  0x7a   : > { %2243 = vmatpush3.bf16.msra.mxu1 %v2389_v29  ;;  %2206 = vmatprep.subr.bf16.mxu0 %v2390_v23 }
  0x7b   : > { %2236 = vmatprep.subr.bf16.mxu1 %v2390_v23 }
  0x7c   : > { %1385 = vmatmul.mubr.bf16.gmra.mrb[36].mxu0 %v2776_v41  ;;  %v2394_v41 = vld [vmem:[%s3301_s1 + $0x230] sm:$0xff]  }
  0x7d   : > { %1482 = vmatmul.mubr.bf16.gmra.mrb[36].mxu1 %v2765_v35  ;;  %1392 = vmatprep.mubr.bf16.mxu0 %v2841_v19  ;;  %v2393_v35 = vld [vmem:[%s3301_s1 + $0x228] sm:$0xff]  }
  0x7e   : > { %1489 = vmatprep.mubr.bf16.mxu1 %v2845_v25  ;;  %2207 = vmatpush3.bf16.msra.mxu0 %v2390_v23 }
  0x7f   : > { %2244 = vmatpush3.bf16.msra.mxu1 %v2390_v23  ;;  %2208 = vmatprep.subr.bf16.mxu0 %v2391_v11 }
  0x80   : > { %2237 = vmatprep.subr.bf16.mxu1 %v2391_v11 }
  0x82   : > { %2209 = vmatpush3.bf16.msra.mxu0 %v2391_v11 }
  0x83   : > { %2245 = vmatpush3.bf16.msra.mxu1 %v2391_v11  ;;  %2210 = vmatprep.subr.bf16.mxu0 %v2392_v17 }
  0x84   : > { %2238 = vmatprep.subr.bf16.mxu1 %v2392_v17  ;;  %1393 = vmatmul.mubr.bf16.gmra.mrb[40].mxu0 %v2805_v60  ;;  %v564_v60 = vpack.c.bf16 %v2975_v63, %v2973_v58 }
  0x85   : > { %1490 = vmatmul.mubr.bf16.gmra.mrb[40].mxu1 %v2800_v57  ;;  %1400 = vmatprep.mubr.bf16.mxu0 %v2887_v52  ;;  %v2395_v57 = vld [vmem:[%s3301_s1 + $0x238] sm:$0xff]  }
  0x86   : > { %1497 = vmatprep.mubr.bf16.mxu1 %v2898_v59  ;;  %2211 = vmatpush3.bf16.msra.mxu0 %v2392_v17 }
  0x87   : > { %2246 = vmatpush3.bf16.msra.mxu1 %v2392_v17  ;;  %2212 = vmatprep.subr.bf16.mxu0 %v2393_v35 }
  0x88   : > { %2239 = vmatprep.subr.bf16.mxu1 %v2393_v35 }
  0x8a   : > { %2213 = vmatpush3.bf16.msra.mxu0 %v2393_v35 }
  0x8b   : > { %2247 = vmatpush3.bf16.msra.mxu1 %v2393_v35  ;;  %2214 = vmatprep.subr.bf16.mxu0 %v2394_v41 }
  0x8c   : > { %2240 = vmatprep.subr.bf16.mxu1 %v2394_v41  ;;  %1401 = vmatmul.mubr.bf16.gmra.mrb[44].mxu0 %v2845_v25 }
  0x8d   : > { %1498 = vmatmul.mubr.bf16.gmra.mrb[44].mxu1 %v2849_v26  ;;  %1408 = vmatprep.mubr.bf16.mxu0 %v2933_v21 }
  0x8e   : > { %1505 = vmatprep.mubr.bf16.mxu1 %v2938_v27  ;;  %2215 = vmatpush3.bf16.msra.mxu0 %v2394_v41 }
  0x8f   : > { %2248 = vmatpush3.bf16.msra.mxu1 %v2394_v41  ;;  %2216 = vmatprep.subr.bf16.mxu0 %v2395_v57 }
  0x90   : > { %2241 = vmatprep.subr.bf16.mxu1 %v2395_v57 }
  0x92   : > { %2217 = vmatpush3.bf16.msra.mxu0 %v2395_v57 }
  0x93   : > { %2249 = vmatpush3.bf16.msra.mxu1 %v2395_v57 }
  0x94   : > { %1409 = vmatmul.mubr.bf16.gmra.mrb[48].mxu0 %v2898_v59 }
  0x95   : > { %1506 = vmatmul.mubr.bf16.gmra.mrb[48].mxu1 %v2902_v61  ;;  %1416 = vmatprep.mubr.bf16.mxu0 %v2959_v40 }
  0x96   : > { %1513 = vmatprep.mubr.bf16.mxu1 %v2967_v49 }
  0x9c   : > { %1417 = vmatmul.mubr.bf16.gmra.mrb[52].mxu0 %v2938_v27 }
  0x9d   : > { %1514 = vmatmul.mubr.bf16.gmra.mrb[52].mxu1 %v2942_v28  ;;  %1424 = vmatprep.mubr.bf16.mxu0 %v3007_v22 }
  0x9e   : > { %1521 = vmatprep.mubr.bf16.mxu1 %v2985_v8 }
  0xa4   : > { %1425 = vmatmul.mubr.bf16.gmra.mrb[56].mxu0 %v2967_v49 }
  0xa5   : > { %1522 = vmatmul.mubr.bf16.gmra.mrb[56].mxu1 %v2963_v44  ;;  %1432 = vmatprep.mubr.bf16.mxu0 %v2987_v9 }
  0xa6   : > { %1529 = vmatprep.mubr.bf16.mxu1 %v565_v16 }
  0xac   : > { %1433 = vmatmul.mubr.bf16.gmra.mrb[60].mxu0 %v2985_v8 }
  0xad   : > { %1530 = vmatmul.mubr.bf16.gmra.mrb[60].mxu1 %v564_v60  ;;  %2218 = vmatprep.mubr.bf16.mxu0 %v2795_v55  ;;  %v3084_v55 = vld [vmem:[%s3302_s2] ss:$0 sm:$0xff] }
  0xae   : > { %2226 = vmatprep.mubr.bf16.mxu1 %v2959_v40 }
  0xb4   : > { %2219 = vmatmul.mubr.bf16.vlgmr.msra.gmra.mrb[64].mxu0 %v2841_v19 }
  0xb5   : > { %2227 = vmatmul.mubr.bf16.vlgmr.msra.gmra.mrb[64].mxu1 %v3007_v22  ;;  %2222 = vmatprep.mubr.bf16.mxu0 %v2887_v52 }
  0xb6   : > { %2230 = vmatprep.mubr.bf16.mxu1 %v2987_v9 }
  0xbc   : > { %2223 = vmatmul.mubr.bf16.gmra.mrb[68].mxu0 %v2933_v21 }
  0xbd   : > { %2231 = vmatmul.mubr.bf16.gmra.mrb[68].mxu1 %v566_v24 }
 0x107   : > { %v1946_v25 = vpop.f32.mrb[0].mxu0 }
 0x108   : > { %v2010_v26 = vpop.f32.mrb[0].mxu1  ;;  %v1947_v19 = vpop.f32.mrb[1].mxu0 }
 0x109   : > { %v2011_v59 = vpop.f32.mrb[1].mxu1  ;;  %v1948_v61 = vadd.f32 %v1947_v19, %v1946_v25  ;;  %v1949_v52 = vpop.f32.mrb[2].mxu0 }
 0x10a   : > { %v2012_v27 = vadd.f32 %v2011_v59, %v2010_v26  ;;  %v2013_v28 = vpop.f32.mrb[2].mxu1  ;;  %v1950_v30 = vpop.f32.mrb[3].mxu0 }
 0x10b   : > { %v2014_v31 = vpop.f32.mrb[3].mxu1  ;;  %v1185_v21 = vadd.f32 %v1948_v61, %v3084_v55  ;;  %v1951_v32 = vadd.f32 %v1950_v30, %v1949_v52 }
 0x10c   : > { %v2015_v33 = vadd.f32 %v2014_v31, %v2013_v28 }
 0x10d   : > { %v3087_v34 = vadd.f32 %v2012_v27, %v1185_v21  ;;  %v1188_v36 = vadd.f32 %v1951_v32, %v3084_v55 }
 0x10f   : > { %v3090_v37 = vadd.f32 %v2015_v33, %v1188_v36  ;;  %v1952_v38 = vpop.f32.mrb[4].mxu0 }
 0x110   : > { %v2016_v39 = vpop.f32.mrb[4].mxu1  ;;  %v1953_v40 = vpop.f32.mrb[5].mxu0 }
 0x111   : > { %v2017_v42 = vpop.f32.mrb[5].mxu1  ;;  %v1954_v43 = vadd.f32 %v1953_v40, %v1952_v38  ;;  %v1955_v45 = vpop.f32.mrb[6].mxu0 }
 0x112   : > { %v2018_v44 = vadd.f32 %v2017_v42, %v2016_v39  ;;  %v2019_v46 = vpop.f32.mrb[6].mxu1  ;;  %v1956_v47 = vpop.f32.mrb[7].mxu0 }
 0x113   : > { %v2020_v48 = vpop.f32.mrb[7].mxu1  ;;  %v1193_v49 = vadd.f32 %v1954_v43, %v3084_v55  ;;  %v1957_v50 = vadd.f32 %v1956_v47, %v1955_v45 }
 0x114   : > { %v2021_v51 = vadd.f32 %v2020_v48, %v2019_v46 }
 0x115   : > { %v3093_v53 = vadd.f32 %v2018_v44, %v1193_v49  ;;  %v1196_v56 = vadd.f32 %v1957_v50, %v3084_v55 }
 0x117   : > { %v3096_v58 = vadd.f32 %v2021_v51, %v1196_v56  ;;  %v1958_v62 = vpop.f32.mrb[8].mxu0 }
 0x118   : > { %v2022_v54 = vpop.f32.mrb[8].mxu1  ;;  %v1959_v63 = vpop.f32.mrb[9].mxu0 }
 0x119   : > { %v2023_v0 = vpop.f32.mrb[9].mxu1  ;;  %v1960_v1 = vadd.f32 %v1959_v63, %v1958_v62  ;;  %v1961_v3 = vpop.f32.mrb[10].mxu0 }
 0x11a   : > { %v2024_v2 = vadd.f32 %v2023_v0, %v2022_v54  ;;  %v2025_v4 = vpop.f32.mrb[10].mxu1  ;;  %v1962_v5 = vpop.f32.mrb[11].mxu0 }
 0x11b   : > { %v2026_v6 = vpop.f32.mrb[11].mxu1  ;;  %v1201_v7 = vadd.f32 %v1960_v1, %v3084_v55  ;;  %v1963_v8 = vadd.f32 %v1962_v5, %v1961_v3 }
 0x11c   : > { %v2027_v9 = vadd.f32 %v2026_v6, %v2025_v4 }
 0x11d   : > { %v3099_v10 = vadd.f32 %v2024_v2, %v1201_v7  ;;  %v1204_v12 = vadd.f32 %v1963_v8, %v3084_v55 }
 0x11f   : > { %v3102_v13 = vadd.f32 %v2027_v9, %v1204_v12  ;;  %v1964_v14 = vpop.f32.mrb[12].mxu0 }
 0x120   : > { %v2028_v15 = vpop.f32.mrb[12].mxu1  ;;  %v1965_v16 = vpop.f32.mrb[13].mxu0 }
 0x121   : > { %v2029_v18 = vpop.f32.mrb[13].mxu1  ;;  %v1966_v20 = vadd.f32 %v1965_v16, %v1964_v14  ;;  %v1967_v24 = vpop.f32.mrb[14].mxu0 }
 0x122   : > { %v2030_v22 = vadd.f32 %v2029_v18, %v2028_v15  ;;  %v2031_v29 = vpop.f32.mrb[14].mxu1  ;;  %v1968_v23 = vpop.f32.mrb[15].mxu0 }
 0x123   : > { %v2032_v11 = vpop.f32.mrb[15].mxu1  ;;  %v1209_v17 = vadd.f32 %v1966_v20, %v3084_v55  ;;  %v1969_v35 = vadd.f32 %v1968_v23, %v1967_v24 }
 0x124   : > { %v2033_v41 = vadd.f32 %v2032_v11, %v2031_v29 }
 0x125   : > { %v3105_v57 = vadd.f32 %v2030_v22, %v1209_v17  ;;  %v1212_v60 = vadd.f32 %v1969_v35, %v3084_v55 }
 0x127   : > { %v3108_v25 = vadd.f32 %v2033_v41, %v1212_v60  ;;  %v1970_v26 = vpop.f32.mrb[16].mxu0 }
 0x128   : > { %v2034_v19 = vpop.f32.mrb[16].mxu1  ;;  %v1971_v59 = vpop.f32.mrb[17].mxu0 }
 0x129   : > { %v2035_v61 = vpop.f32.mrb[17].mxu1  ;;  %v1972_v27 = vadd.f32 %v1971_v59, %v1970_v26  ;;  %v1973_v28 = vpop.f32.mrb[18].mxu0 }
 0x12a   : > { %v2036_v52 = vadd.f32 %v2035_v61, %v2034_v19  ;;  %v2037_v30 = vpop.f32.mrb[18].mxu1  ;;  %v1974_v31 = vpop.f32.mrb[19].mxu0 }
 0x12b   : > { %v2038_v21 = vpop.f32.mrb[19].mxu1  ;;  %v1217_v32 = vadd.f32 %v1972_v27, %v3084_v55  ;;  %v1975_v33 = vadd.f32 %v1974_v31, %v1973_v28 }
 0x12c   : > { %v2039_v36 = vadd.f32 %v2038_v21, %v2037_v30 }
 0x12d   : > { %v3111_v38 = vadd.f32 %v2036_v52, %v1217_v32  ;;  %v1220_v39 = vadd.f32 %v1975_v33, %v3084_v55 }
 0x12f   : > { %v3114_v40 = vadd.f32 %v2039_v36, %v1220_v39  ;;  %v1976_v42 = vpop.f32.mrb[20].mxu0 }
 0x130   : > { %v2040_v43 = vpop.f32.mrb[20].mxu1  ;;  %v1977_v44 = vpop.f32.mrb[21].mxu0 }
 0x131   : > { %v2041_v45 = vpop.f32.mrb[21].mxu1  ;;  %v1978_v46 = vadd.f32 %v1977_v44, %v1976_v42  ;;  %v1979_v48 = vpop.f32.mrb[22].mxu0 }
 0x132   : > { %v2042_v47 = vadd.f32 %v2041_v45, %v2040_v43  ;;  %v2043_v49 = vpop.f32.mrb[22].mxu1  ;;  %v1980_v50 = vpop.f32.mrb[23].mxu0 }
 0x133   : > { %v2044_v51 = vpop.f32.mrb[23].mxu1  ;;  %v1225_v56 = vadd.f32 %v1978_v46, %v3084_v55  ;;  %v1981_v62 = vadd.f32 %v1980_v50, %v1979_v48 }
 0x134   : > { %v2045_v54 = vadd.f32 %v2044_v51, %v2043_v49 }
 0x135   : > { %v3117_v63 = vadd.f32 %v2042_v47, %v1225_v56  ;;  %v1228_v0 = vadd.f32 %v1981_v62, %v3084_v55 }
 0x137   : > { %v3120_v1 = vadd.f32 %v2045_v54, %v1228_v0  ;;  %v1982_v2 = vpop.f32.mrb[24].mxu0 }
 0x138   : > { %v2046_v3 = vpop.f32.mrb[24].mxu1  ;;  %v1983_v4 = vpop.f32.mrb[25].mxu0 }
 0x139   : > { %v2047_v5 = vpop.f32.mrb[25].mxu1  ;;  %v1984_v6 = vadd.f32 %v1983_v4, %v1982_v2  ;;  %v1985_v8 = vpop.f32.mrb[26].mxu0 }
 0x13a   : > { %v2048_v7 = vadd.f32 %v2047_v5, %v2046_v3  ;;  %v2049_v9 = vpop.f32.mrb[26].mxu1  ;;  %v1986_v12 = vpop.f32.mrb[27].mxu0 }
 0x13b   : > { %v2050_v14 = vpop.f32.mrb[27].mxu1  ;;  %v1233_v15 = vadd.f32 %v1984_v6, %v3084_v55  ;;  %v1987_v16 = vadd.f32 %v1986_v12, %v1985_v8 }
 0x13c   : > { %v2051_v18 = vadd.f32 %v2050_v14, %v2049_v9 }
 0x13d   : > { %v3123_v20 = vadd.f32 %v2048_v7, %v1233_v15  ;;  %v1236_v22 = vadd.f32 %v1987_v16, %v3084_v55 }
 0x13f   : > { %v3126_v24 = vadd.f32 %v2051_v18, %v1236_v22  ;;  %v1988_v29 = vpop.f32.mrb[28].mxu0 }
 0x140   : > { %v2052_v23 = vpop.f32.mrb[28].mxu1  ;;  %v1989_v11 = vpop.f32.mrb[29].mxu0 }
 0x141   : > { %v2053_v17 = vpop.f32.mrb[29].mxu1  ;;  %v1990_v35 = vadd.f32 %v1989_v11, %v1988_v29  ;;  %v1991_v60 = vpop.f32.mrb[30].mxu0 }
 0x142   : > { %v2054_v41 = vadd.f32 %v2053_v17, %v2052_v23  ;;  %v2055_v26 = vpop.f32.mrb[30].mxu1  ;;  %v1992_v19 = vpop.f32.mrb[31].mxu0 }
 0x143   : > { %v2056_v59 = vpop.f32.mrb[31].mxu1  ;;  %v1241_v61 = vadd.f32 %v1990_v35, %v3084_v55  ;;  %v1993_v27 = vadd.f32 %v1992_v19, %v1991_v60 }
 0x144   : > { %v2057_v52 = vadd.f32 %v2056_v59, %v2055_v26 }
 0x145   : > { %v3129_v28 = vadd.f32 %v2054_v41, %v1241_v61  ;;  %v1244_v30 = vadd.f32 %v1993_v27, %v3084_v55 }
 0x147   : > { %v3132_v31 = vadd.f32 %v2057_v52, %v1244_v30  ;;  %v2074_v21 = vpop.f32.mrb[32].mxu0 }
 0x148   : > { %v2138_v32 = vpop.f32.mrb[32].mxu1  ;;  %v2075_v33 = vpop.f32.mrb[33].mxu0 }
 0x149   : > { %v2139_v36 = vpop.f32.mrb[33].mxu1  ;;  %v2076_v39 = vadd.f32 %v2075_v33, %v2074_v21  ;;  %v2077_v43 = vpop.f32.mrb[34].mxu0 }
 0x14a   : > { %v2140_v42 = vadd.f32 %v2139_v36, %v2138_v32  ;;  %v2141_v44 = vpop.f32.mrb[34].mxu1  ;;  %v2078_v45 = vpop.f32.mrb[35].mxu0 }
 0x14b   : > { %v2142_v46 = vpop.f32.mrb[35].mxu1  ;;  %v1379_v47 = vadd.f32 %v2076_v39, %v3087_v34  ;;  %v2079_v48 = vadd.f32 %v2078_v45, %v2077_v43 }
 0x14c   : > { %v2143_v49 = vadd.f32 %v2142_v46, %v2141_v44 }
 0x14d   : > { %v1382_v50 = vadd.f32 %v2079_v48, %v3090_v37  ;;  %v3136_v51 = vadd.f32 %v2140_v42, %v1379_v47 }
 0x14f   : > { %v2080_v55 = vpop.f32.mrb[36].mxu0  ;;  %v3138_v62 = vadd.f32 %v2143_v49, %v1382_v50 }
 0x150   : > { %v2144_v56 = vpop.f32.mrb[36].mxu1  ;;  %v2081_v54 = vpop.f32.mrb[37].mxu0 }
 0x151   : > { %v2145_v0 = vpop.f32.mrb[37].mxu1  ;;  %v2082_v2 = vadd.f32 %v2081_v54, %v2080_v55  ;;  %v2083_v4 = vpop.f32.mrb[38].mxu0 }
 0x152   : > { %v2146_v3 = vadd.f32 %v2145_v0, %v2144_v56  ;;  %v2147_v5 = vpop.f32.mrb[38].mxu1  ;;  %v2084_v6 = vpop.f32.mrb[39].mxu0 }
 0x153   : > { %v2148_v7 = vpop.f32.mrb[39].mxu1  ;;  %v1387_v34 = vadd.f32 %v2082_v2, %v3093_v53  ;;  %v2085_v8 = vadd.f32 %v2084_v6, %v2083_v4 }
 0x154   : > { %v2149_v9 = vadd.f32 %v2148_v7, %v2147_v5 }
 0x155   : > { %v1390_v37 = vadd.f32 %v2085_v8, %v3096_v58  ;;  %v3142_v12 = vadd.f32 %v2146_v3, %v1387_v34 }
 0x157   : > { %v2086_v14 = vpop.f32.mrb[40].mxu0  ;;  %v3144_v16 = vadd.f32 %v2149_v9, %v1390_v37 }
 0x158   : > { %v2150_v15 = vpop.f32.mrb[40].mxu1  ;;  %v2087_v18 = vpop.f32.mrb[41].mxu0 }
 0x159   : > { %v2151_v22 = vpop.f32.mrb[41].mxu1  ;;  %v2088_v29 = vadd.f32 %v2087_v18, %v2086_v14  ;;  %v2089_v11 = vpop.f32.mrb[42].mxu0 }
 0x15a   : > { %v2152_v23 = vadd.f32 %v2151_v22, %v2150_v15  ;;  %v2153_v17 = vpop.f32.mrb[42].mxu1  ;;  %v2090_v35 = vpop.f32.mrb[43].mxu0 }
 0x15b   : > { %v2154_v41 = vpop.f32.mrb[43].mxu1  ;;  %v1395_v53 = vadd.f32 %v2088_v29, %v3099_v10  ;;  %v2091_v60 = vadd.f32 %v2090_v35, %v2089_v11 }
 0x15c   : > { %v2155_v26 = vadd.f32 %v2154_v41, %v2153_v17 }
 0x15d   : > { %v1398_v58 = vadd.f32 %v2091_v60, %v3102_v13  ;;  %v3148_v19 = vadd.f32 %v2152_v23, %v1395_v53 }
 0x15f   : > { %v2092_v59 = vpop.f32.mrb[44].mxu0  ;;  %v3150_v27 = vadd.f32 %v2155_v26, %v1398_v58 }
 0x160   : > { %v2156_v61 = vpop.f32.mrb[44].mxu1  ;;  %v2093_v52 = vpop.f32.mrb[45].mxu0 }
 0x161   : > { %v2157_v30 = vpop.f32.mrb[45].mxu1  ;;  %v2094_v21 = vadd.f32 %v2093_v52, %v2092_v59  ;;  %v2095_v33 = vpop.f32.mrb[46].mxu0 }
 0x162   : > { %v2158_v32 = vadd.f32 %v2157_v30, %v2156_v61  ;;  %v2159_v36 = vpop.f32.mrb[46].mxu1  ;;  %v2096_v39 = vpop.f32.mrb[47].mxu0 }
 0x163   : > { %v2160_v42 = vpop.f32.mrb[47].mxu1  ;;  %v1403_v10 = vadd.f32 %v2094_v21, %v3105_v57  ;;  %v2097_v43 = vadd.f32 %v2096_v39, %v2095_v33 }
 0x164   : > { %v2161_v44 = vadd.f32 %v2160_v42, %v2159_v36 }
 0x165   : > { %v1406_v13 = vadd.f32 %v2097_v43, %v3108_v25  ;;  %v3154_v45 = vadd.f32 %v2158_v32, %v1403_v10 }
 0x167   : > { %v2098_v46 = vpop.f32.mrb[48].mxu0  ;;  %v3156_v48 = vadd.f32 %v2161_v44, %v1406_v13 }
 0x168   : > { %v2162_v47 = vpop.f32.mrb[48].mxu1  ;;  %v2099_v49 = vpop.f32.mrb[49].mxu0 }
 0x169   : > { %v2163_v50 = vpop.f32.mrb[49].mxu1  ;;  %v2100_v55 = vadd.f32 %v2099_v49, %v2098_v46  ;;  %v2101_v54 = vpop.f32.mrb[50].mxu0 }
 0x16a   : > { %v2164_v56 = vadd.f32 %v2163_v50, %v2162_v47  ;;  %v2165_v0 = vpop.f32.mrb[50].mxu1  ;;  %v2102_v2 = vpop.f32.mrb[51].mxu0 }
 0x16b   : > { %v2166_v3 = vpop.f32.mrb[51].mxu1  ;;  %v1411_v57 = vadd.f32 %v2100_v55, %v3111_v38  ;;  %v2103_v4 = vadd.f32 %v2102_v2, %v2101_v54 }
 0x16c   : > { %v2167_v5 = vadd.f32 %v2166_v3, %v2165_v0  ;;  %v1637_v3 = vld [vmem:[%s3179_s30 + $0x10] sm:$0xff] }
 0x16d   : > { %v1414_v25 = vadd.f32 %v2103_v4, %v3114_v40  ;;  %v3160_v6 = vadd.f32 %v2164_v56, %v1411_v57  ;;  %v1645_v4 = vld [vmem:[%s3179_s30 + $0x50] sm:$0xff] }
 0x16f   : > { %v2104_v7 = vpop.f32.mrb[52].mxu0  ;;  %v3162_v8 = vadd.f32 %v2167_v5, %v1414_v25 }
 0x170   : > { %v2168_v34 = vpop.f32.mrb[52].mxu1  ;;  %v2105_v9 = vpop.f32.mrb[53].mxu0 }
 0x171   : > { %v2169_v37 = vpop.f32.mrb[53].mxu1  ;;  %v2106_v14 = vadd.f32 %v2105_v9, %v2104_v7  ;;  %v2107_v18 = vpop.f32.mrb[54].mxu0  ;;  %v1635_v9 = vld [vmem:[%s3179_s30] sm:$0xff] }
 0x172   : > { %v2170_v15 = vadd.f32 %v2169_v37, %v2168_v34  ;;  %v2171_v22 = vpop.f32.mrb[54].mxu1  ;;  %v2108_v29 = vpop.f32.mrb[55].mxu0 }
 0x173   : > { %v2172_v23 = vpop.f32.mrb[55].mxu1  ;;  %v1419_v38 = vadd.f32 %v2106_v14, %v3117_v63  ;;  %v2109_v11 = vadd.f32 %v2108_v29, %v2107_v18 }
 0x174   : > { %v2173_v17 = vadd.f32 %v2172_v23, %v2171_v22  ;;  %v1638_v22 = vld [vmem:[%s3179_s30 + $0x18] sm:$0xff] }
 0x175   : > { %v1422_v40 = vadd.f32 %v2109_v11, %v3120_v1  ;;  %v1516_v35 = vadd.f32 %v2170_v15, %v1419_v38  ;;  %v1646_v23 = vld [vmem:[%s3179_s30 + $0x58] sm:$0xff] }
 0x177   : > { %v2110_v41 = vpop.f32.mrb[56].mxu0  ;;  %v1519_v60 = vadd.f32 %v2173_v17, %v1422_v40 }
 0x178   : > { %v2174_v53 = vpop.f32.mrb[56].mxu1  ;;  %v2111_v26 = vpop.f32.mrb[57].mxu0 }
 0x179   : > { %v2175_v58 = vpop.f32.mrb[57].mxu1  ;;  %v2112_v59 = vadd.f32 %v2111_v26, %v2110_v41  ;;  %v2113_v52 = vpop.f32.mrb[58].mxu0 }
 0x17a   : > { %v2176_v61 = vadd.f32 %v2175_v58, %v2174_v53  ;;  %v2177_v30 = vpop.f32.mrb[58].mxu1  ;;  %v2114_v21 = vpop.f32.mrb[59].mxu0  ;;  %v1644_v53 = vld [vmem:[%s3179_s30 + $0x48] sm:$0xff] }
 0x17b   : > { %v2178_v32 = vpop.f32.mrb[59].mxu1  ;;  %v1427_v63 = vadd.f32 %v2112_v59, %v3123_v20  ;;  %v2115_v33 = vadd.f32 %v2114_v21, %v2113_v52 }
 0x17c   : > { %v2179_v36 = vadd.f32 %v2178_v32, %v2177_v30  ;;  %v1649_v30 = vld [vmem:[%s3179_s30 + $0x70] sm:$0xff] }
 0x17d   : > { %v1430_v1 = vadd.f32 %v2115_v33, %v3126_v24  ;;  %v3170_v39 = vadd.f32 %v2176_v61, %v1427_v63  ;;  %v1641_v61 = vld [vmem:[%s3179_s30 + $0x30] sm:$0xff]  ;;  %v1639_v33 = vld [vmem:[%s3179_s30 + $0x20] sm:$0xff] }
 0x17f   : > { %v2116_v42 = vpop.f32.mrb[60].mxu0  ;;  %v3172_v43 = vadd.f32 %v2179_v36, %v1430_v1  ;;  %v1647_v1 = vld [vmem:[%s3179_s30 + $0x60] sm:$0xff] }
 0x180   : > { %v2180_v10 = vpop.f32.mrb[60].mxu1  ;;  %v2117_v44 = vpop.f32.mrb[61].mxu0 }
 0x181   : > { %v2181_v13 = vpop.f32.mrb[61].mxu1  ;;  %v2118_v46 = vadd.f32 %v2117_v44, %v2116_v42  ;;  %v2119_v20 = vpop.f32.mrb[62].mxu0 }
 0x182   : > { %v2182_v47 = vadd.f32 %v2181_v13, %v2180_v10  ;;  %v2183_v49 = vpop.f32.mrb[62].mxu1  ;;  %v2120_v50 = vpop.f32.mrb[63].mxu0  ;;  %v1642_v13 = vld [vmem:[%s3179_s30 + $0x38] sm:$0xff] }
 0x183   : > { %v2184_v55 = vpop.f32.mrb[63].mxu1  ;;  %v1435_v24 = vadd.f32 %v2118_v46, %v3129_v28  ;;  %v2121_v56 = vadd.f32 %v2120_v50, %v2119_v20 }
 0x184   : > { %v2185_v54 = vadd.f32 %v2184_v55, %v2183_v49 }
 0x185   : > { %v1438_v0 = vadd.f32 %v2121_v56, %v3132_v31  ;;  %v1532_v2 = vadd.f32 %v2182_v47, %v1435_v24  ;;  %v1643_v31 = vld [vmem:[%s3179_s30 + $0x40] sm:$0xff]  ;;  %v1650_v47 = vld [vmem:[%s3179_s30 + $0x78] sm:$0xff]  ;;  %v1640_v24 = vld [vmem:[%s3179_s30 + $0x28] sm:$0xff] }
 0x187   : > { %v2220_v28 = vpop.f32.mrb[64].mxu0  ;;  %v1535_v5 = vadd.f32 %v2185_v54, %v1438_v0 }
 0x188   : > { %v2228_v57 = vpop.f32.mrb[64].mxu1  ;;  %v1581_v25 = vadd.f32 %v2220_v28, %v3142_v12  ;;  %v1572_v34 = vpop.f32.mrb[65].mxu0 }
 0x189   : > { %v1613_v7 = vadd.f32 %v2228_v57, %v1516_v35  ;;  %v1604_v37 = vpop.f32.mrb[65].mxu1  ;;  %v1573_v14 = vadd.f32 %v1572_v34, %v3136_v51  ;;  %v2221_v18 = vpop.f32.mrb[66].mxu0  ;;  %v1636_v35 = vld [vmem:[%s3179_s30 + $0x8] sm:$0xff] }
 0x18a   : > { %v1605_v15 = vadd.f32 %v1604_v37, %v3160_v6  ;;  %v2229_v29 = vpop.f32.mrb[66].mxu1  ;;  %v1653_v38 = vadd.f32 %v1637_v3, %v1581_v25  ;;  %v1584_v11 = vadd.f32 %v2221_v18, %v3144_v16  ;;  %v1575_v40 = vpop.f32.mrb[67].mxu0 }
 0x18b   : > { %v1661_v12 = vadd.f32 %v1645_v4, %v1613_v7  ;;  %v1616_v17 = vadd.f32 %v2229_v29, %v1519_v60  ;;  %v1607_v41 = vpop.f32.mrb[67].mxu1  ;;  %v1651_v26 = vadd.f32 %v1635_v9, %v1573_v14  ;;  %v1576_v6 = vadd.f32 %v1575_v40, %v3138_v62 }
 0x18c   : > { %v1659_v51 = vadd.f32 %v1643_v31, %v1605_v15  ;;  %v1608_v58 = vadd.f32 %v1607_v41, %v3162_v8  ;;  %1669 = vst [vmem:[%s3203_s9 + $0x10] sm:$0xff] %v1653_v38  ;;  %v1654_v16 = vadd.f32 %v1638_v22, %v1584_v11 }
 0x18d   : > { %1677 = vst [vmem:[%s3203_s9 + $0x50] sm:$0xff] %v1661_v12  ;;  %v1662_v62 = vadd.f32 %v1646_v23, %v1616_v17  ;;  %1667 = vst [vmem:[%s3203_s9] sm:$0xff] %v1651_v26  ;;  %v1652_v8 = vadd.f32 %v1636_v35, %v1576_v6 }
 0x18e   : > { %1675 = vst [vmem:[%s3203_s9 + $0x40] sm:$0xff] %v1659_v51  ;;  %v1660_v60 = vadd.f32 %v1644_v53, %v1608_v58  ;;  %1670 = vst [vmem:[%s3203_s9 + $0x18] sm:$0xff] %v1654_v16 }
 0x18f   : > { %1678 = vst [vmem:[%s3203_s9 + $0x58] sm:$0xff] %v1662_v62  ;;  %1668 = vst [vmem:[%s3203_s9 + $0x8] sm:$0xff] %v1652_v8  ;;  %v2224_v59 = vpop.f32.mrb[68].mxu0 }
 0x190   : > { %1676 = vst [vmem:[%s3203_s9 + $0x48] sm:$0xff] %v1660_v60  ;;  %v2232_v52 = vpop.f32.mrb[68].mxu1  ;;  %v1597_v21 = vadd.f32 %v2224_v59, %v3154_v45  ;;  %v1588_v63 = vpop.f32.mrb[69].mxu0 }
 0x191   : > { %v1629_v32 = vadd.f32 %v2232_v52, %v1532_v2  ;;  %v1620_v36 = vpop.f32.mrb[69].mxu1  ;;  %v1589_v42 = vadd.f32 %v1588_v63, %v3148_v19  ;;  %v2225_v44 = vpop.f32.mrb[70].mxu0 }
 0x192   : > { %v1621_v10 = vadd.f32 %v1620_v36, %v3170_v39  ;;  %v2233_v46 = vpop.f32.mrb[70].mxu1  ;;  %v1657_v45 = vadd.f32 %v1641_v61, %v1597_v21  ;;  %v1600_v49 = vadd.f32 %v2225_v44, %v3156_v48  ;;  %v1591_v55 = vpop.f32.mrb[71].mxu0  ;;  %v1648_v39 = vld [vmem:[%s3179_s30 + $0x68] sm:$0xff]  ;;  %s2402_s30 = scalar_lea.vmem %s2401_s27, 4096 }
 0x193   : > { %v1665_v20 = vadd.f32 %v1649_v30, %v1629_v32  ;;  %v1632_v50 = vadd.f32 %v2233_v46, %v1535_v5  ;;  %v1623_v19 = vpop.f32.mrb[71].mxu1  ;;  %v1655_v56 = vadd.f32 %v1639_v33, %v1589_v42  ;;  %v1592_v0 = vadd.f32 %v1591_v55, %v3150_v27  ;;  %p2404_p5 = scmp.lt.s32.totalorder %s2402_s30, %s2396_s11 }
 0x194   : > { %v1663_v54 = vadd.f32 %v1647_v1, %v1621_v10  ;;  %v1624_v2 = vadd.f32 %v1623_v19, %v3172_v43  ;;  %1673 = vst [vmem:[%s3203_s9 + $0x30] sm:$0xff] %v1657_v45  ;;  %v1658_v48 = vadd.f32 %v1642_v13, %v1600_v49 }
 0x195   : > { %1681 = vst [vmem:[%s3203_s9 + $0x70] sm:$0xff] %v1665_v20  ;;  %v1666_v28 = vadd.f32 %v1650_v47, %v1632_v50  ;;  %1671 = vst [vmem:[%s3203_s9 + $0x20] sm:$0xff] %v1655_v56  ;;  %v1656_v27 = vadd.f32 %v1640_v24, %v1592_v0  ;;  %p2405_p6 = por %p2404_p5, %p2403_p4 }
 0x196   : > { %1679 = vst [vmem:[%s3203_s9 + $0x60] sm:$0xff] %v1663_v54  ;;  %v1664_v3 = vadd.f32 %v1648_v39, %v1624_v2  ;;  %1674 = vst [vmem:[%s3203_s9 + $0x38] sm:$0xff] %v1658_v48 }
 0x197   : > { %1682 = vst [vmem:[%s3203_s9 + $0x78] sm:$0xff] %v1666_v28  ;;  %1672 = vst [vmem:[%s3203_s9 + $0x28] sm:$0xff] %v1656_v27  ;;  %p2406_p7 = pnand %p2405_p6, %p2399_p2 }
 0x198   : > { %1680 = vst [vmem:[%s3203_s9 + $0x68] sm:$0xff] %v1664_v3 }
 0x199   : > { %2409 = shalt.err (!%p2406_p7)
}
 0x19a   : > { %s2410_s6 = scalar_lea.hbm %s3236_s13, 2048  ;;  %s2414_s12 = scalar_lea.hbm %s3304_s4, 8192 }
 0x19b   : > { %p2411_p9 = scmp.ne.s32.totalorder %s3236_s13, %s2410_s6  ;;  %p2415_p12 = scmp.lt.u32.totalorder %s3236_s13, %s3304_s4 }
 0x19c   : > { %p2416_p13 = scmp.lt.u32.totalorder %s2414_s12, %s2410_s6  ;;  %p2418_p1 = scmp.lt.u32.totalorder %s2410_s6, %s3236_s13 }
 0x19d   : > { %p2412_p10 = pnand %p2411_p9, %p2571_p3 }
 0x19e   : > { %p2417_p0 = por %p2416_p13, %p2415_p12 }
 0x19f   : > { %p2413_p11 = pneg %p2412_p10 }
 0x1a0   : > { %p2419_p2 = por %p2418_p1, %p2417_p0 }
 0x1a2   : > { %p2420_p4 = pnand %p2419_p2, %p2413_p11 }
 0x1a4   : > { %2423 = shalt.err (!%p2420_p4)
}
 0x1a5   : > { %s2493_s19 = smov 128   ;;  %s2494_s26 = smov 8  }
 0x1a6   : > { %2251 = dma.vmem_to_hbm [thread:$0]  (%p2571_p3), %s3238_s10, 2048, %s3236_s13, %s3248_s14, %s2493_s19, %s2493_s19, %s2494_s26  }
 0x1a7 PF: > { %p2257_p5 = scmp.ge.s32.totalorder %s2490_s22, 2  ;;  %s1716_s24 = sand.u32 1, %s2462_s15  }
 0x1a8   : > { %s1717_s11 = scalar_lea.sflag [#allocation3], %s1716_s24 }
 0x1a9   : > { %p2254_p6 = pnand %p2257_p5, %p2580_p8 }
 0x1ab   : > { %2457 = dma.done.wait (!%p2254_p6), %s1717_s11, 2048  }
 0x1ac   : > { %2459 = vsyncadd (!%p2254_p6), %s1717_s11, 4294965248  ;;  %s17_s22 = sadd.s32 1, %s2490_s22   ;;  %s3309_s28 = sld [smem:[#allocation5_spill]] }
 0x1ad   : > { %p14_p7 = scmp.ge.s32.totalorder %s17_s22, 6   ;;  %s3310_s15 = smov %s2466_s16 }
 0x1ae   : > { %s3311_s16 = smov %s2470_s17  ;;  %s3312_s17 = smov %s2589_s7 }
 0x1af   : > { %s3313_s18 = smov %s2482_s20  ;;  %s3314_s19 = smov %s2486_s21 }
 0x1b0   : > { %s3315_s20 = smov %s3318_s25  ;;  %16 = sbr.rel (!%p14_p7) target bundleno = 5 (0x5), region = 81 }
 0x1b2   : > { %s3316_s21 = smov %s3309_s28 }
 0x1b7   :  { %1722 = vsyncpa [#allocation3], 1 }
 0x1b8   :  { %1724 = vsyncpa [#allocation3 + $0x1], 1 }

</bundles_post_ra>
